<compile_context>
chip_gen: v6e
topology: v6e:2x2x1
jax: 0.10.0
libtpu: 0.0.40
codegen_flags: <defaults>
</compile_context>

<pallas_src>
from functools import partial

import jax
import jax.numpy as jnp
from jax import lax
from jax.experimental import pallas as pl
from jax.experimental.pallas import tpu as pltpu

EPS = 1e-5
# Tap order matches w_taps = transpose(w, (2,3,0,1)).reshape(9, C, C).
_TAPS = tuple((dy, dx) for dy in (-1, 0, 1) for dx in (-1, 0, 1))


def _residual_block_kernel(x_ref, w_ref, mask_ref, gamma_ref, beta_ref,
                           o_ref, conv_scr, x_scr, scale_scr, shift_scr,
                           *, W):
    """Fused conv3x3 + BatchNorm(train) + residual on (C, H*W) tiles.

    grid = (phase, n):
      phase 0: conv of batch tile n -> conv_scr[n]; stash x tile -> x_scr[n].
      phase 1: n == 0 finalizes batch statistics into scale/shift scratch;
               every n writes  x + conv * scale + shift  to its output tile.
    """
    phase = pl.program_id(0)
    n = pl.program_id(1)
    Nb, C, P = conv_scr.shape

    @pl.when(phase == 0)
    def _conv_phase():
        x_raw = x_ref[0]                                   # (C, H*W)
        xf = x_raw.astype(jnp.float32)
        conv = jnp.zeros((C, P), jnp.float32)
        for t, (dy, dx) in enumerate(_TAPS):
            off = dy * W + dx
            if off == 0:
                shifted = xf
            else:
                # shifted[p] = x[p + off] (flat spatial shift); the
                # precomputed border mask zeroes destinations whose source
                # pixel is outside the image == the conv's zero padding.
                shifted = jnp.roll(xf, -off, axis=1) * mask_ref[t]
            w_tap = w_ref[t].astype(jnp.float32)           # (C_out, C_in)
            # Small-C channel mix on the VPU via broadcast FMAs: at C=4 an
            # MXU matmul would be <3% utilized, so keep it off the MXU.
            for ci in range(C):
                conv = conv + w_tap[:, ci:ci + 1] * shifted[ci:ci + 1, :]
        conv_scr[n] = conv
        x_scr[n] = x_raw                                   # residual stash

    @pl.when(phase == 1)
    def _norm_phase():
        @pl.when(n == 0)
        def _finalize_stats():
            # Exact two-pass batch statistics over the resident conv scratch
            # (biased variance, matching PyTorch BatchNorm2d training mode).
            cnt = float(Nb * P)
            s = jnp.zeros((C, 1), jnp.float32)
            for i in range(Nb):
                s = s + jnp.sum(conv_scr[i], axis=1, keepdims=True)
            mean = s / cnt                                  # (C, 1)
            v = jnp.zeros((C, 1), jnp.float32)
            for i in range(Nb):
                d = conv_scr[i] - mean
                v = v + jnp.sum(d * d, axis=1, keepdims=True)
            var = v / cnt                                   # (C, 1)
            scale = gamma_ref[...] * lax.rsqrt(var + EPS)   # (C, 1)
            scale_scr[...] = scale
            shift_scr[...] = beta_ref[...] - mean * scale

        y = (x_scr[n].astype(jnp.float32)
             + conv_scr[n] * scale_scr[...] + shift_scr[...])
        o_ref[0] = y.astype(o_ref.dtype)


@jax.jit
def _forward(x_nchw, w_oihw, gamma, beta):
    N, C, H, W = x_nchw.shape
    P = H * W

    # NCHW -> (N, C, H*W): pure reshape of contiguous dims -- no HBM relayout.
    x_flat = x_nchw.reshape(N, C, P)

    # (C_out, C_in, kH, kW) -> (9 taps, C_out, C_in): tiny 9*C*C relayout.
    w_taps = jnp.transpose(w_oihw, (2, 3, 0, 1)).reshape(9, C, C)

    # Precomputed 0/1 border masks implementing zero padding for each of the
    # nine flat spatial shifts (dy*W + dx).  Tiny constant table (9 x H*W).
    pos = jnp.arange(P, dtype=jnp.int32)
    col, row = pos % W, pos // W
    masks = jnp.stack([
        ((col + dx >= 0) & (col + dx < W) & (row + dy >= 0) & (row + dy < H))
        for dy, dx in _TAPS]).astype(jnp.float32).reshape(9, 1, P)

    g = gamma.astype(jnp.float32).reshape(C, 1)
    b = beta.astype(jnp.float32).reshape(C, 1)

    fixed3 = lambda p, n: (0, 0, 0)
    fixed2 = lambda p, n: (0, 0)

    out_flat = pl.pallas_call(
        partial(_residual_block_kernel, W=W),
        out_shape=jax.ShapeDtypeStruct((N, C, P), x_nchw.dtype),
        grid_spec=pltpu.PrefetchScalarGridSpec(
            num_scalar_prefetch=0,
            grid=(2, N),                               # (phase, batch tile)
            in_specs=[
                # Batch tile n in phase 0; parked on tile 0 in phase 1 (the
                # residual is read from the VMEM stash instead of HBM).
                pl.BlockSpec((1, C, P), lambda p, n: ((1 - p) * n, 0, 0)),
                pl.BlockSpec((9, C, C), fixed3),       # conv weights
                pl.BlockSpec((9, 1, P), fixed3),       # border masks
                pl.BlockSpec((C, 1), fixed2),          # gamma
                pl.BlockSpec((C, 1), fixed2),          # beta
            ],
            # Output tile n is only produced (and written back) in phase 1.
            out_specs=pl.BlockSpec((1, C, P), lambda p, n: (p * n, 0, 0)),
            scratch_shapes=[
                pltpu.VMEM((N, C, P), jnp.float32),    # conv output, resident
                pltpu.VMEM((N, C, P), x_nchw.dtype),   # input stash (residual)
                pltpu.VMEM((C, 1), jnp.float32),       # folded BN scale
                pltpu.VMEM((C, 1), jnp.float32),       # folded BN shift
            ]),
        # Batch statistics couple all tiles across both phases -> sequential
        # grid (loses megacore batch sharding; irrelevant at this size).
        compiler_params=pltpu.CompilerParams(
            dimension_semantics=("arbitrary", "arbitrary")),
    )(x_flat, w_taps, masks, g, b)

    return out_flat.reshape(N, C, H, W)    # free reshape back to NCHW


def residual_block(x_nchw, w_oihw, gamma, beta):
    """input + BatchNorm2d(Conv2d(input, 3x3, pad=1, bias=False)) -- NCHW."""
    return _forward(x_nchw, w_oihw, gamma, beta)


def _reference(x_nchw, w_oihw, gamma, beta):
    """Pure-JAX reference matching PyTorch semantics (training-mode BN)."""
    conv = lax.conv_general_dilated(
        x_nchw.astype(jnp.float32), w_oihw.astype(jnp.float32),
        window_strides=(1, 1), padding=((1, 1), (1, 1)),
        dimension_numbers=("NCHW", "OIHW", "NCHW"))
    mean = jnp.mean(conv, axis=(0, 2, 3), keepdims=True)
    var = jnp.mean(jnp.square(conv - mean), axis=(0, 2, 3), keepdims=True)
    bn = (conv - mean) * lax.rsqrt(var + EPS)
    bn = bn * gamma.reshape(1, -1, 1, 1) + beta.reshape(1, -1, 1, 1)
    return x_nchw + bn.astype(x_nchw.dtype)


if __name__ == "__main__":
    N, C, H, W = 2, 4, 16, 16
    kx, kw, kg, kb = jax.random.split(jax.random.PRNGKey(0), 4)
    x = jax.random.normal(kx, (N, C, H, W), dtype=jnp.float32)
    # PyTorch-style OIHW conv weight, kaiming-ish scale.
    w = jax.random.normal(kw, (C, C, 3, 3), dtype=jnp.float32) * 0.1
    # Non-trivial affine parameters to exercise the gamma/beta fold.
    gamma = 1.0 + 0.1 * jax.random.normal(kg, (C,), dtype=jnp.float32)
    beta = 0.1 * jax.random.normal(kb, (C,), dtype=jnp.float32)

    out = jax.block_until_ready(residual_block(x, w, gamma, beta))
    ref = _reference(x, w, gamma, beta)

    assert out.shape == (N, C, H, W)
    assert jnp.allclose(out, ref, atol=1e-4, rtol=1e-4), "mismatch vs reference"
    print("KERNEL_OK")
</pallas_src>

<mosaic_0001>
module attributes {stable_mosaic.version = 11 : i64} {
  func.func @_residual_block_kernel(%arg0: i32, %arg1: i32, %arg2: memref<1x4x256xf32, #tpu.memory_space<vmem>>, %arg3: memref<9x4x4xf32, #tpu.memory_space<vmem>>, %arg4: memref<9x1x256xf32, #tpu.memory_space<vmem>>, %arg5: memref<4x1xf32, #tpu.memory_space<vmem>>, %arg6: memref<4x1xf32, #tpu.memory_space<vmem>>, %arg7: memref<1x4x256xf32, #tpu.memory_space<vmem>>, %arg8: memref<2x4x256xf32, #tpu.memory_space<vmem>>, %arg9: memref<2x4x256xf32, #tpu.memory_space<vmem>>, %arg10: memref<4x1xf32, #tpu.memory_space<vmem>>, %arg11: memref<4x1xf32, #tpu.memory_space<vmem>>) attributes {dimension_semantics = [#tpu.dimension_semantics<arbitrary>, #tpu.dimension_semantics<arbitrary>], iteration_bounds = array<i64: 2, 2>, scalar_prefetch = 0 : i64, scratch_operands = 4 : i64, tpu.core_type = #tpu.core_type<tc>, window_params = [{transform_indices = @transform_0, window_bounds = array<i64: 1, 4, 256>}, {pipeline_mode = #tpu.pipeline_mode<synchronous>, transform_indices = @transform_1, window_bounds = array<i64: 9, 4, 4>}, {pipeline_mode = #tpu.pipeline_mode<synchronous>, transform_indices = @transform_2, window_bounds = array<i64: 9, 1, 256>}, {pipeline_mode = #tpu.pipeline_mode<synchronous>, transform_indices = @transform_3, window_bounds = array<i64: 4, 1>}, {pipeline_mode = #tpu.pipeline_mode<synchronous>, transform_indices = @transform_4, window_bounds = array<i64: 4, 1>}, {transform_indices = @transform_5, window_bounds = array<i64: 1, 4, 256>}]} {
    %c0_i32 = arith.constant 0 : i32
    %0 = arith.cmpi eq, %arg0, %c0_i32 : i32
    %1 = arith.extui %0 : i1 to i32
    %c0_i32_0 = arith.constant 0 : i32
    %2 = arith.cmpi ne, %1, %c0_i32_0 : i32
    scf.if %2 {
      %c0 = arith.constant 0 : index
      %c0_2 = arith.constant 0 : index
      %c0_3 = arith.constant 0 : index
      %6 = vector.load %arg2[%c0, %c0_2, %c0_3] : memref<1x4x256xf32, #tpu.memory_space<vmem>>, vector<1x4x256xf32>
      %7 = vector.shape_cast %6 : vector<1x4x256xf32> to vector<4x256xf32>
      %cst = arith.constant 0.000000e+00 : f32
      %8 = vector.broadcast %cst : f32 to vector<4x256xf32>
      %9 = vector.extract_strided_slice %7 {offsets = [0, 239], sizes = [4, 17], strides = [1, 1]} : vector<4x256xf32> to vector<4x17xf32>
      %10 = vector.extract_strided_slice %7 {offsets = [0, 0], sizes = [4, 239], strides = [1, 1]} : vector<4x256xf32> to vector<4x239xf32>
      %11 = tpu.concatenate %9, %10 in 1 : vector<4x17xf32>, vector<4x239xf32> -> vector<4x256xf32>
      %c0_4 = arith.constant 0 : index
      %c0_5 = arith.constant 0 : index
      %c0_6 = arith.constant 0 : index
      %12 = vector.load %arg4[%c0_4, %c0_5, %c0_6] : memref<9x1x256xf32, #tpu.memory_space<vmem>>, vector<1x1x256xf32>
      %13 = vector.shape_cast %12 : vector<1x1x256xf32> to vector<1x256xf32>
      %14 = vector.broadcast %13 : vector<1x256xf32> to vector<4x256xf32>
      %15 = arith.mulf %11, %14 : vector<4x256xf32>
      %c0_7 = arith.constant 0 : index
      %c0_8 = arith.constant 0 : index
      %c0_9 = arith.constant 0 : index
      %16 = vector.load %arg3[%c0_7, %c0_8, %c0_9] : memref<9x4x4xf32, #tpu.memory_space<vmem>>, vector<1x4x4xf32>
      %17 = vector.shape_cast %16 : vector<1x4x4xf32> to vector<4x4xf32>
      %18 = vector.extract_strided_slice %17 {offsets = [0, 0], sizes = [4, 1], strides = [1, 1]} : vector<4x4xf32> to vector<4x1xf32>
      %19 = vector.extract_strided_slice %15 {offsets = [0, 0], sizes = [1, 256], strides = [1, 1]} : vector<4x256xf32> to vector<1x256xf32>
      %20 = vector.broadcast %18 : vector<4x1xf32> to vector<4x256xf32>
      %21 = vector.broadcast %19 : vector<1x256xf32> to vector<4x256xf32>
      %22 = arith.mulf %20, %21 : vector<4x256xf32>
      %23 = arith.addf %8, %22 : vector<4x256xf32>
      %24 = vector.extract_strided_slice %17 {offsets = [0, 1], sizes = [4, 1], strides = [1, 1]} : vector<4x4xf32> to vector<4x1xf32>
      %25 = vector.extract_strided_slice %15 {offsets = [1, 0], sizes = [1, 256], strides = [1, 1]} : vector<4x256xf32> to vector<1x256xf32>
      %26 = vector.broadcast %24 : vector<4x1xf32> to vector<4x256xf32>
      %27 = vector.broadcast %25 : vector<1x256xf32> to vector<4x256xf32>
      %28 = arith.mulf %26, %27 : vector<4x256xf32>
      %29 = arith.addf %23, %28 : vector<4x256xf32>
      %30 = vector.extract_strided_slice %17 {offsets = [0, 2], sizes = [4, 1], strides = [1, 1]} : vector<4x4xf32> to vector<4x1xf32>
      %31 = vector.extract_strided_slice %15 {offsets = [2, 0], sizes = [1, 256], strides = [1, 1]} : vector<4x256xf32> to vector<1x256xf32>
      %32 = vector.broadcast %30 : vector<4x1xf32> to vector<4x256xf32>
      %33 = vector.broadcast %31 : vector<1x256xf32> to vector<4x256xf32>
      %34 = arith.mulf %32, %33 : vector<4x256xf32>
      %35 = arith.addf %29, %34 : vector<4x256xf32>
      %36 = vector.extract_strided_slice %17 {offsets = [0, 3], sizes = [4, 1], strides = [1, 1]} : vector<4x4xf32> to vector<4x1xf32>
      %37 = vector.extract_strided_slice %15 {offsets = [3, 0], sizes = [1, 256], strides = [1, 1]} : vector<4x256xf32> to vector<1x256xf32>
      %38 = vector.broadcast %36 : vector<4x1xf32> to vector<4x256xf32>
      %39 = vector.broadcast %37 : vector<1x256xf32> to vector<4x256xf32>
      %40 = arith.mulf %38, %39 : vector<4x256xf32>
      %41 = arith.addf %35, %40 : vector<4x256xf32>
      %42 = vector.extract_strided_slice %7 {offsets = [0, 240], sizes = [4, 16], strides = [1, 1]} : vector<4x256xf32> to vector<4x16xf32>
      %43 = vector.extract_strided_slice %7 {offsets = [0, 0], sizes = [4, 240], strides = [1, 1]} : vector<4x256xf32> to vector<4x240xf32>
      %44 = tpu.concatenate %42, %43 in 1 : vector<4x16xf32>, vector<4x240xf32> -> vector<4x256xf32>
      %c1 = arith.constant 1 : index
      %c0_10 = arith.constant 0 : index
      %c0_11 = arith.constant 0 : index
      %45 = vector.load %arg4[%c1, %c0_10, %c0_11] : memref<9x1x256xf32, #tpu.memory_space<vmem>>, vector<1x1x256xf32>
      %46 = vector.shape_cast %45 : vector<1x1x256xf32> to vector<1x256xf32>
      %47 = vector.broadcast %46 : vector<1x256xf32> to vector<4x256xf32>
      %48 = arith.mulf %44, %47 : vector<4x256xf32>
      %c1_12 = arith.constant 1 : index
      %c0_13 = arith.constant 0 : index
      %c0_14 = arith.constant 0 : index
      %49 = vector.load %arg3[%c1_12, %c0_13, %c0_14] : memref<9x4x4xf32, #tpu.memory_space<vmem>>, vector<1x4x4xf32>
      %50 = vector.shape_cast %49 : vector<1x4x4xf32> to vector<4x4xf32>
      %51 = vector.extract_strided_slice %50 {offsets = [0, 0], sizes = [4, 1], strides = [1, 1]} : vector<4x4xf32> to vector<4x1xf32>
      %52 = vector.extract_strided_slice %48 {offsets = [0, 0], sizes = [1, 256], strides = [1, 1]} : vector<4x256xf32> to vector<1x256xf32>
      %53 = vector.broadcast %51 : vector<4x1xf32> to vector<4x256xf32>
      %54 = vector.broadcast %52 : vector<1x256xf32> to vector<4x256xf32>
      %55 = arith.mulf %53, %54 : vector<4x256xf32>
      %56 = arith.addf %41, %55 : vector<4x256xf32>
      %57 = vector.extract_strided_slice %50 {offsets = [0, 1], sizes = [4, 1], strides = [1, 1]} : vector<4x4xf32> to vector<4x1xf32>
      %58 = vector.extract_strided_slice %48 {offsets = [1, 0], sizes = [1, 256], strides = [1, 1]} : vector<4x256xf32> to vector<1x256xf32>
      %59 = vector.broadcast %57 : vector<4x1xf32> to vector<4x256xf32>
      %60 = vector.broadcast %58 : vector<1x256xf32> to vector<4x256xf32>
      %61 = arith.mulf %59, %60 : vector<4x256xf32>
      %62 = arith.addf %56, %61 : vector<4x256xf32>
      %63 = vector.extract_strided_slice %50 {offsets = [0, 2], sizes = [4, 1], strides = [1, 1]} : vector<4x4xf32> to vector<4x1xf32>
      %64 = vector.extract_strided_slice %48 {offsets = [2, 0], sizes = [1, 256], strides = [1, 1]} : vector<4x256xf32> to vector<1x256xf32>
      %65 = vector.broadcast %63 : vector<4x1xf32> to vector<4x256xf32>
      %66 = vector.broadcast %64 : vector<1x256xf32> to vector<4x256xf32>
      %67 = arith.mulf %65, %66 : vector<4x256xf32>
      %68 = arith.addf %62, %67 : vector<4x256xf32>
      %69 = vector.extract_strided_slice %50 {offsets = [0, 3], sizes = [4, 1], strides = [1, 1]} : vector<4x4xf32> to vector<4x1xf32>
      %70 = vector.extract_strided_slice %48 {offsets = [3, 0], sizes = [1, 256], strides = [1, 1]} : vector<4x256xf32> to vector<1x256xf32>
      %71 = vector.broadcast %69 : vector<4x1xf32> to vector<4x256xf32>
      %72 = vector.broadcast %70 : vector<1x256xf32> to vector<4x256xf32>
      %73 = arith.mulf %71, %72 : vector<4x256xf32>
      %74 = arith.addf %68, %73 : vector<4x256xf32>
      %75 = vector.extract_strided_slice %7 {offsets = [0, 241], sizes = [4, 15], strides = [1, 1]} : vector<4x256xf32> to vector<4x15xf32>
      %76 = vector.extract_strided_slice %7 {offsets = [0, 0], sizes = [4, 241], strides = [1, 1]} : vector<4x256xf32> to vector<4x241xf32>
      %77 = tpu.concatenate %75, %76 in 1 : vector<4x15xf32>, vector<4x241xf32> -> vector<4x256xf32>
      %c2 = arith.constant 2 : index
      %c0_15 = arith.constant 0 : index
      %c0_16 = arith.constant 0 : index
      %78 = vector.load %arg4[%c2, %c0_15, %c0_16] : memref<9x1x256xf32, #tpu.memory_space<vmem>>, vector<1x1x256xf32>
      %79 = vector.shape_cast %78 : vector<1x1x256xf32> to vector<1x256xf32>
      %80 = vector.broadcast %79 : vector<1x256xf32> to vector<4x256xf32>
      %81 = arith.mulf %77, %80 : vector<4x256xf32>
      %c2_17 = arith.constant 2 : index
      %c0_18 = arith.constant 0 : index
      %c0_19 = arith.constant 0 : index
      %82 = vector.load %arg3[%c2_17, %c0_18, %c0_19] : memref<9x4x4xf32, #tpu.memory_space<vmem>>, vector<1x4x4xf32>
      %83 = vector.shape_cast %82 : vector<1x4x4xf32> to vector<4x4xf32>
      %84 = vector.extract_strided_slice %83 {offsets = [0, 0], sizes = [4, 1], strides = [1, 1]} : vector<4x4xf32> to vector<4x1xf32>
      %85 = vector.extract_strided_slice %81 {offsets = [0, 0], sizes = [1, 256], strides = [1, 1]} : vector<4x256xf32> to vector<1x256xf32>
      %86 = vector.broadcast %84 : vector<4x1xf32> to vector<4x256xf32>
      %87 = vector.broadcast %85 : vector<1x256xf32> to vector<4x256xf32>
      %88 = arith.mulf %86, %87 : vector<4x256xf32>
      %89 = arith.addf %74, %88 : vector<4x256xf32>
      %90 = vector.extract_strided_slice %83 {offsets = [0, 1], sizes = [4, 1], strides = [1, 1]} : vector<4x4xf32> to vector<4x1xf32>
      %91 = vector.extract_strided_slice %81 {offsets = [1, 0], sizes = [1, 256], strides = [1, 1]} : vector<4x256xf32> to vector<1x256xf32>
      %92 = vector.broadcast %90 : vector<4x1xf32> to vector<4x256xf32>
      %93 = vector.broadcast %91 : vector<1x256xf32> to vector<4x256xf32>
      %94 = arith.mulf %92, %93 : vector<4x256xf32>
      %95 = arith.addf %89, %94 : vector<4x256xf32>
      %96 = vector.extract_strided_slice %83 {offsets = [0, 2], sizes = [4, 1], strides = [1, 1]} : vector<4x4xf32> to vector<4x1xf32>
      %97 = vector.extract_strided_slice %81 {offsets = [2, 0], sizes = [1, 256], strides = [1, 1]} : vector<4x256xf32> to vector<1x256xf32>
      %98 = vector.broadcast %96 : vector<4x1xf32> to vector<4x256xf32>
      %99 = vector.broadcast %97 : vector<1x256xf32> to vector<4x256xf32>
      %100 = arith.mulf %98, %99 : vector<4x256xf32>
      %101 = arith.addf %95, %100 : vector<4x256xf32>
      %102 = vector.extract_strided_slice %83 {offsets = [0, 3], sizes = [4, 1], strides = [1, 1]} : vector<4x4xf32> to vector<4x1xf32>
      %103 = vector.extract_strided_slice %81 {offsets = [3, 0], sizes = [1, 256], strides = [1, 1]} : vector<4x256xf32> to vector<1x256xf32>
      %104 = vector.broadcast %102 : vector<4x1xf32> to vector<4x256xf32>
      %105 = vector.broadcast %103 : vector<1x256xf32> to vector<4x256xf32>
      %106 = arith.mulf %104, %105 : vector<4x256xf32>
      %107 = arith.addf %101, %106 : vector<4x256xf32>
      %108 = vector.extract_strided_slice %7 {offsets = [0, 255], sizes = [4, 1], strides = [1, 1]} : vector<4x256xf32> to vector<4x1xf32>
      %109 = vector.extract_strided_slice %7 {offsets = [0, 0], sizes = [4, 255], strides = [1, 1]} : vector<4x256xf32> to vector<4x255xf32>
      %110 = tpu.concatenate %108, %109 in 1 : vector<4x1xf32>, vector<4x255xf32> -> vector<4x256xf32>
      %c3 = arith.constant 3 : index
      %c0_20 = arith.constant 0 : index
      %c0_21 = arith.constant 0 : index
      %111 = vector.load %arg4[%c3, %c0_20, %c0_21] : memref<9x1x256xf32, #tpu.memory_space<vmem>>, vector<1x1x256xf32>
      %112 = vector.shape_cast %111 : vector<1x1x256xf32> to vector<1x256xf32>
      %113 = vector.broadcast %112 : vector<1x256xf32> to vector<4x256xf32>
      %114 = arith.mulf %110, %113 : vector<4x256xf32>
      %c3_22 = arith.constant 3 : index
      %c0_23 = arith.constant 0 : index
      %c0_24 = arith.constant 0 : index
      %115 = vector.load %arg3[%c3_22, %c0_23, %c0_24] : memref<9x4x4xf32, #tpu.memory_space<vmem>>, vector<1x4x4xf32>
      %116 = vector.shape_cast %115 : vector<1x4x4xf32> to vector<4x4xf32>
      %117 = vector.extract_strided_slice %116 {offsets = [0, 0], sizes = [4, 1], strides = [1, 1]} : vector<4x4xf32> to vector<4x1xf32>
      %118 = vector.extract_strided_slice %114 {offsets = [0, 0], sizes = [1, 256], strides = [1, 1]} : vector<4x256xf32> to vector<1x256xf32>
      %119 = vector.broadcast %117 : vector<4x1xf32> to vector<4x256xf32>
      %120 = vector.broadcast %118 : vector<1x256xf32> to vector<4x256xf32>
      %121 = arith.mulf %119, %120 : vector<4x256xf32>
      %122 = arith.addf %107, %121 : vector<4x256xf32>
      %123 = vector.extract_strided_slice %116 {offsets = [0, 1], sizes = [4, 1], strides = [1, 1]} : vector<4x4xf32> to vector<4x1xf32>
      %124 = vector.extract_strided_slice %114 {offsets = [1, 0], sizes = [1, 256], strides = [1, 1]} : vector<4x256xf32> to vector<1x256xf32>
      %125 = vector.broadcast %123 : vector<4x1xf32> to vector<4x256xf32>
      %126 = vector.broadcast %124 : vector<1x256xf32> to vector<4x256xf32>
      %127 = arith.mulf %125, %126 : vector<4x256xf32>
      %128 = arith.addf %122, %127 : vector<4x256xf32>
      %129 = vector.extract_strided_slice %116 {offsets = [0, 2], sizes = [4, 1], strides = [1, 1]} : vector<4x4xf32> to vector<4x1xf32>
      %130 = vector.extract_strided_slice %114 {offsets = [2, 0], sizes = [1, 256], strides = [1, 1]} : vector<4x256xf32> to vector<1x256xf32>
      %131 = vector.broadcast %129 : vector<4x1xf32> to vector<4x256xf32>
      %132 = vector.broadcast %130 : vector<1x256xf32> to vector<4x256xf32>
      %133 = arith.mulf %131, %132 : vector<4x256xf32>
      %134 = arith.addf %128, %133 : vector<4x256xf32>
      %135 = vector.extract_strided_slice %116 {offsets = [0, 3], sizes = [4, 1], strides = [1, 1]} : vector<4x4xf32> to vector<4x1xf32>
      %136 = vector.extract_strided_slice %114 {offsets = [3, 0], sizes = [1, 256], strides = [1, 1]} : vector<4x256xf32> to vector<1x256xf32>
      %137 = vector.broadcast %135 : vector<4x1xf32> to vector<4x256xf32>
      %138 = vector.broadcast %136 : vector<1x256xf32> to vector<4x256xf32>
      %139 = arith.mulf %137, %138 : vector<4x256xf32>
      %140 = arith.addf %134, %139 : vector<4x256xf32>
      %c4 = arith.constant 4 : index
      %c0_25 = arith.constant 0 : index
      %c0_26 = arith.constant 0 : index
      %141 = vector.load %arg3[%c4, %c0_25, %c0_26] : memref<9x4x4xf32, #tpu.memory_space<vmem>>, vector<1x4x4xf32>
      %142 = vector.shape_cast %141 : vector<1x4x4xf32> to vector<4x4xf32>
      %143 = vector.extract_strided_slice %142 {offsets = [0, 0], sizes = [4, 1], strides = [1, 1]} : vector<4x4xf32> to vector<4x1xf32>
      %144 = vector.extract_strided_slice %7 {offsets = [0, 0], sizes = [1, 256], strides = [1, 1]} : vector<4x256xf32> to vector<1x256xf32>
      %145 = vector.broadcast %143 : vector<4x1xf32> to vector<4x256xf32>
      %146 = vector.broadcast %144 : vector<1x256xf32> to vector<4x256xf32>
      %147 = arith.mulf %145, %146 : vector<4x256xf32>
      %148 = arith.addf %140, %147 : vector<4x256xf32>
      %149 = vector.extract_strided_slice %142 {offsets = [0, 1], sizes = [4, 1], strides = [1, 1]} : vector<4x4xf32> to vector<4x1xf32>
      %150 = vector.extract_strided_slice %7 {offsets = [1, 0], sizes = [1, 256], strides = [1, 1]} : vector<4x256xf32> to vector<1x256xf32>
      %151 = vector.broadcast %149 : vector<4x1xf32> to vector<4x256xf32>
      %152 = vector.broadcast %150 : vector<1x256xf32> to vector<4x256xf32>
      %153 = arith.mulf %151, %152 : vector<4x256xf32>
      %154 = arith.addf %148, %153 : vector<4x256xf32>
      %155 = vector.extract_strided_slice %142 {offsets = [0, 2], sizes = [4, 1], strides = [1, 1]} : vector<4x4xf32> to vector<4x1xf32>
      %156 = vector.extract_strided_slice %7 {offsets = [2, 0], sizes = [1, 256], strides = [1, 1]} : vector<4x256xf32> to vector<1x256xf32>
      %157 = vector.broadcast %155 : vector<4x1xf32> to vector<4x256xf32>
      %158 = vector.broadcast %156 : vector<1x256xf32> to vector<4x256xf32>
      %159 = arith.mulf %157, %158 : vector<4x256xf32>
      %160 = arith.addf %154, %159 : vector<4x256xf32>
      %161 = vector.extract_strided_slice %142 {offsets = [0, 3], sizes = [4, 1], strides = [1, 1]} : vector<4x4xf32> to vector<4x1xf32>
      %162 = vector.extract_strided_slice %7 {offsets = [3, 0], sizes = [1, 256], strides = [1, 1]} : vector<4x256xf32> to vector<1x256xf32>
      %163 = vector.broadcast %161 : vector<4x1xf32> to vector<4x256xf32>
      %164 = vector.broadcast %162 : vector<1x256xf32> to vector<4x256xf32>
      %165 = arith.mulf %163, %164 : vector<4x256xf32>
      %166 = arith.addf %160, %165 : vector<4x256xf32>
      %167 = vector.extract_strided_slice %7 {offsets = [0, 1], sizes = [4, 255], strides = [1, 1]} : vector<4x256xf32> to vector<4x255xf32>
      %168 = vector.extract_strided_slice %7 {offsets = [0, 0], sizes = [4, 1], strides = [1, 1]} : vector<4x256xf32> to vector<4x1xf32>
      %169 = tpu.concatenate %167, %168 in 1 : vector<4x255xf32>, vector<4x1xf32> -> vector<4x256xf32>
      %c5 = arith.constant 5 : index
      %c0_27 = arith.constant 0 : index
      %c0_28 = arith.constant 0 : index
      %170 = vector.load %arg4[%c5, %c0_27, %c0_28] : memref<9x1x256xf32, #tpu.memory_space<vmem>>, vector<1x1x256xf32>
      %171 = vector.shape_cast %170 : vector<1x1x256xf32> to vector<1x256xf32>
      %172 = vector.broadcast %171 : vector<1x256xf32> to vector<4x256xf32>
      %173 = arith.mulf %169, %172 : vector<4x256xf32>
      %c5_29 = arith.constant 5 : index
      %c0_30 = arith.constant 0 : index
      %c0_31 = arith.constant 0 : index
      %174 = vector.load %arg3[%c5_29, %c0_30, %c0_31] : memref<9x4x4xf32, #tpu.memory_space<vmem>>, vector<1x4x4xf32>
      %175 = vector.shape_cast %174 : vector<1x4x4xf32> to vector<4x4xf32>
      %176 = vector.extract_strided_slice %175 {offsets = [0, 0], sizes = [4, 1], strides = [1, 1]} : vector<4x4xf32> to vector<4x1xf32>
      %177 = vector.extract_strided_slice %173 {offsets = [0, 0], sizes = [1, 256], strides = [1, 1]} : vector<4x256xf32> to vector<1x256xf32>
      %178 = vector.broadcast %176 : vector<4x1xf32> to vector<4x256xf32>
      %179 = vector.broadcast %177 : vector<1x256xf32> to vector<4x256xf32>
      %180 = arith.mulf %178, %179 : vector<4x256xf32>
      %181 = arith.addf %166, %180 : vector<4x256xf32>
      %182 = vector.extract_strided_slice %175 {offsets = [0, 1], sizes = [4, 1], strides = [1, 1]} : vector<4x4xf32> to vector<4x1xf32>
      %183 = vector.extract_strided_slice %173 {offsets = [1, 0], sizes = [1, 256], strides = [1, 1]} : vector<4x256xf32> to vector<1x256xf32>
      %184 = vector.broadcast %182 : vector<4x1xf32> to vector<4x256xf32>
      %185 = vector.broadcast %183 : vector<1x256xf32> to vector<4x256xf32>
      %186 = arith.mulf %184, %185 : vector<4x256xf32>
      %187 = arith.addf %181, %186 : vector<4x256xf32>
      %188 = vector.extract_strided_slice %175 {offsets = [0, 2], sizes = [4, 1], strides = [1, 1]} : vector<4x4xf32> to vector<4x1xf32>
      %189 = vector.extract_strided_slice %173 {offsets = [2, 0], sizes = [1, 256], strides = [1, 1]} : vector<4x256xf32> to vector<1x256xf32>
      %190 = vector.broadcast %188 : vector<4x1xf32> to vector<4x256xf32>
      %191 = vector.broadcast %189 : vector<1x256xf32> to vector<4x256xf32>
      %192 = arith.mulf %190, %191 : vector<4x256xf32>
      %193 = arith.addf %187, %192 : vector<4x256xf32>
      %194 = vector.extract_strided_slice %175 {offsets = [0, 3], sizes = [4, 1], strides = [1, 1]} : vector<4x4xf32> to vector<4x1xf32>
      %195 = vector.extract_strided_slice %173 {offsets = [3, 0], sizes = [1, 256], strides = [1, 1]} : vector<4x256xf32> to vector<1x256xf32>
      %196 = vector.broadcast %194 : vector<4x1xf32> to vector<4x256xf32>
      %197 = vector.broadcast %195 : vector<1x256xf32> to vector<4x256xf32>
      %198 = arith.mulf %196, %197 : vector<4x256xf32>
      %199 = arith.addf %193, %198 : vector<4x256xf32>
      %200 = vector.extract_strided_slice %7 {offsets = [0, 15], sizes = [4, 241], strides = [1, 1]} : vector<4x256xf32> to vector<4x241xf32>
      %201 = vector.extract_strided_slice %7 {offsets = [0, 0], sizes = [4, 15], strides = [1, 1]} : vector<4x256xf32> to vector<4x15xf32>
      %202 = tpu.concatenate %200, %201 in 1 : vector<4x241xf32>, vector<4x15xf32> -> vector<4x256xf32>
      %c6 = arith.constant 6 : index
      %c0_32 = arith.constant 0 : index
      %c0_33 = arith.constant 0 : index
      %203 = vector.load %arg4[%c6, %c0_32, %c0_33] : memref<9x1x256xf32, #tpu.memory_space<vmem>>, vector<1x1x256xf32>
      %204 = vector.shape_cast %203 : vector<1x1x256xf32> to vector<1x256xf32>
      %205 = vector.broadcast %204 : vector<1x256xf32> to vector<4x256xf32>
      %206 = arith.mulf %202, %205 : vector<4x256xf32>
      %c6_34 = arith.constant 6 : index
      %c0_35 = arith.constant 0 : index
      %c0_36 = arith.constant 0 : index
      %207 = vector.load %arg3[%c6_34, %c0_35, %c0_36] : memref<9x4x4xf32, #tpu.memory_space<vmem>>, vector<1x4x4xf32>
      %208 = vector.shape_cast %207 : vector<1x4x4xf32> to vector<4x4xf32>
      %209 = vector.extract_strided_slice %208 {offsets = [0, 0], sizes = [4, 1], strides = [1, 1]} : vector<4x4xf32> to vector<4x1xf32>
      %210 = vector.extract_strided_slice %206 {offsets = [0, 0], sizes = [1, 256], strides = [1, 1]} : vector<4x256xf32> to vector<1x256xf32>
      %211 = vector.broadcast %209 : vector<4x1xf32> to vector<4x256xf32>
      %212 = vector.broadcast %210 : vector<1x256xf32> to vector<4x256xf32>
      %213 = arith.mulf %211, %212 : vector<4x256xf32>
      %214 = arith.addf %199, %213 : vector<4x256xf32>
      %215 = vector.extract_strided_slice %208 {offsets = [0, 1], sizes = [4, 1], strides = [1, 1]} : vector<4x4xf32> to vector<4x1xf32>
      %216 = vector.extract_strided_slice %206 {offsets = [1, 0], sizes = [1, 256], strides = [1, 1]} : vector<4x256xf32> to vector<1x256xf32>
      %217 = vector.broadcast %215 : vector<4x1xf32> to vector<4x256xf32>
      %218 = vector.broadcast %216 : vector<1x256xf32> to vector<4x256xf32>
      %219 = arith.mulf %217, %218 : vector<4x256xf32>
      %220 = arith.addf %214, %219 : vector<4x256xf32>
      %221 = vector.extract_strided_slice %208 {offsets = [0, 2], sizes = [4, 1], strides = [1, 1]} : vector<4x4xf32> to vector<4x1xf32>
      %222 = vector.extract_strided_slice %206 {offsets = [2, 0], sizes = [1, 256], strides = [1, 1]} : vector<4x256xf32> to vector<1x256xf32>
      %223 = vector.broadcast %221 : vector<4x1xf32> to vector<4x256xf32>
      %224 = vector.broadcast %222 : vector<1x256xf32> to vector<4x256xf32>
      %225 = arith.mulf %223, %224 : vector<4x256xf32>
      %226 = arith.addf %220, %225 : vector<4x256xf32>
      %227 = vector.extract_strided_slice %208 {offsets = [0, 3], sizes = [4, 1], strides = [1, 1]} : vector<4x4xf32> to vector<4x1xf32>
      %228 = vector.extract_strided_slice %206 {offsets = [3, 0], sizes = [1, 256], strides = [1, 1]} : vector<4x256xf32> to vector<1x256xf32>
      %229 = vector.broadcast %227 : vector<4x1xf32> to vector<4x256xf32>
      %230 = vector.broadcast %228 : vector<1x256xf32> to vector<4x256xf32>
      %231 = arith.mulf %229, %230 : vector<4x256xf32>
      %232 = arith.addf %226, %231 : vector<4x256xf32>
      %233 = vector.extract_strided_slice %7 {offsets = [0, 16], sizes = [4, 240], strides = [1, 1]} : vector<4x256xf32> to vector<4x240xf32>
      %234 = vector.extract_strided_slice %7 {offsets = [0, 0], sizes = [4, 16], strides = [1, 1]} : vector<4x256xf32> to vector<4x16xf32>
      %235 = tpu.concatenate %233, %234 in 1 : vector<4x240xf32>, vector<4x16xf32> -> vector<4x256xf32>
      %c7 = arith.constant 7 : index
      %c0_37 = arith.constant 0 : index
      %c0_38 = arith.constant 0 : index
      %236 = vector.load %arg4[%c7, %c0_37, %c0_38] : memref<9x1x256xf32, #tpu.memory_space<vmem>>, vector<1x1x256xf32>
      %237 = vector.shape_cast %236 : vector<1x1x256xf32> to vector<1x256xf32>
      %238 = vector.broadcast %237 : vector<1x256xf32> to vector<4x256xf32>
      %239 = arith.mulf %235, %238 : vector<4x256xf32>
      %c7_39 = arith.constant 7 : index
      %c0_40 = arith.constant 0 : index
      %c0_41 = arith.constant 0 : index
      %240 = vector.load %arg3[%c7_39, %c0_40, %c0_41] : memref<9x4x4xf32, #tpu.memory_space<vmem>>, vector<1x4x4xf32>
      %241 = vector.shape_cast %240 : vector<1x4x4xf32> to vector<4x4xf32>
      %242 = vector.extract_strided_slice %241 {offsets = [0, 0], sizes = [4, 1], strides = [1, 1]} : vector<4x4xf32> to vector<4x1xf32>
      %243 = vector.extract_strided_slice %239 {offsets = [0, 0], sizes = [1, 256], strides = [1, 1]} : vector<4x256xf32> to vector<1x256xf32>
      %244 = vector.broadcast %242 : vector<4x1xf32> to vector<4x256xf32>
      %245 = vector.broadcast %243 : vector<1x256xf32> to vector<4x256xf32>
      %246 = arith.mulf %244, %245 : vector<4x256xf32>
      %247 = arith.addf %232, %246 : vector<4x256xf32>
      %248 = vector.extract_strided_slice %241 {offsets = [0, 1], sizes = [4, 1], strides = [1, 1]} : vector<4x4xf32> to vector<4x1xf32>
      %249 = vector.extract_strided_slice %239 {offsets = [1, 0], sizes = [1, 256], strides = [1, 1]} : vector<4x256xf32> to vector<1x256xf32>
      %250 = vector.broadcast %248 : vector<4x1xf32> to vector<4x256xf32>
      %251 = vector.broadcast %249 : vector<1x256xf32> to vector<4x256xf32>
      %252 = arith.mulf %250, %251 : vector<4x256xf32>
      %253 = arith.addf %247, %252 : vector<4x256xf32>
      %254 = vector.extract_strided_slice %241 {offsets = [0, 2], sizes = [4, 1], strides = [1, 1]} : vector<4x4xf32> to vector<4x1xf32>
      %255 = vector.extract_strided_slice %239 {offsets = [2, 0], sizes = [1, 256], strides = [1, 1]} : vector<4x256xf32> to vector<1x256xf32>
      %256 = vector.broadcast %254 : vector<4x1xf32> to vector<4x256xf32>
      %257 = vector.broadcast %255 : vector<1x256xf32> to vector<4x256xf32>
      %258 = arith.mulf %256, %257 : vector<4x256xf32>
      %259 = arith.addf %253, %258 : vector<4x256xf32>
      %260 = vector.extract_strided_slice %241 {offsets = [0, 3], sizes = [4, 1], strides = [1, 1]} : vector<4x4xf32> to vector<4x1xf32>
      %261 = vector.extract_strided_slice %239 {offsets = [3, 0], sizes = [1, 256], strides = [1, 1]} : vector<4x256xf32> to vector<1x256xf32>
      %262 = vector.broadcast %260 : vector<4x1xf32> to vector<4x256xf32>
      %263 = vector.broadcast %261 : vector<1x256xf32> to vector<4x256xf32>
      %264 = arith.mulf %262, %263 : vector<4x256xf32>
      %265 = arith.addf %259, %264 : vector<4x256xf32>
      %266 = vector.extract_strided_slice %7 {offsets = [0, 17], sizes = [4, 239], strides = [1, 1]} : vector<4x256xf32> to vector<4x239xf32>
      %267 = vector.extract_strided_slice %7 {offsets = [0, 0], sizes = [4, 17], strides = [1, 1]} : vector<4x256xf32> to vector<4x17xf32>
      %268 = tpu.concatenate %266, %267 in 1 : vector<4x239xf32>, vector<4x17xf32> -> vector<4x256xf32>
      %c8 = arith.constant 8 : index
      %c0_42 = arith.constant 0 : index
      %c0_43 = arith.constant 0 : index
      %269 = vector.load %arg4[%c8, %c0_42, %c0_43] : memref<9x1x256xf32, #tpu.memory_space<vmem>>, vector<1x1x256xf32>
      %270 = vector.shape_cast %269 : vector<1x1x256xf32> to vector<1x256xf32>
      %271 = vector.broadcast %270 : vector<1x256xf32> to vector<4x256xf32>
      %272 = arith.mulf %268, %271 : vector<4x256xf32>
      %c8_44 = arith.constant 8 : index
      %c0_45 = arith.constant 0 : index
      %c0_46 = arith.constant 0 : index
      %273 = vector.load %arg3[%c8_44, %c0_45, %c0_46] : memref<9x4x4xf32, #tpu.memory_space<vmem>>, vector<1x4x4xf32>
      %274 = vector.shape_cast %273 : vector<1x4x4xf32> to vector<4x4xf32>
      %275 = vector.extract_strided_slice %274 {offsets = [0, 0], sizes = [4, 1], strides = [1, 1]} : vector<4x4xf32> to vector<4x1xf32>
      %276 = vector.extract_strided_slice %272 {offsets = [0, 0], sizes = [1, 256], strides = [1, 1]} : vector<4x256xf32> to vector<1x256xf32>
      %277 = vector.broadcast %275 : vector<4x1xf32> to vector<4x256xf32>
      %278 = vector.broadcast %276 : vector<1x256xf32> to vector<4x256xf32>
      %279 = arith.mulf %277, %278 : vector<4x256xf32>
      %280 = arith.addf %265, %279 : vector<4x256xf32>
      %281 = vector.extract_strided_slice %274 {offsets = [0, 1], sizes = [4, 1], strides = [1, 1]} : vector<4x4xf32> to vector<4x1xf32>
      %282 = vector.extract_strided_slice %272 {offsets = [1, 0], sizes = [1, 256], strides = [1, 1]} : vector<4x256xf32> to vector<1x256xf32>
      %283 = vector.broadcast %281 : vector<4x1xf32> to vector<4x256xf32>
      %284 = vector.broadcast %282 : vector<1x256xf32> to vector<4x256xf32>
      %285 = arith.mulf %283, %284 : vector<4x256xf32>
      %286 = arith.addf %280, %285 : vector<4x256xf32>
      %287 = vector.extract_strided_slice %274 {offsets = [0, 2], sizes = [4, 1], strides = [1, 1]} : vector<4x4xf32> to vector<4x1xf32>
      %288 = vector.extract_strided_slice %272 {offsets = [2, 0], sizes = [1, 256], strides = [1, 1]} : vector<4x256xf32> to vector<1x256xf32>
      %289 = vector.broadcast %287 : vector<4x1xf32> to vector<4x256xf32>
      %290 = vector.broadcast %288 : vector<1x256xf32> to vector<4x256xf32>
      %291 = arith.mulf %289, %290 : vector<4x256xf32>
      %292 = arith.addf %286, %291 : vector<4x256xf32>
      %293 = vector.extract_strided_slice %274 {offsets = [0, 3], sizes = [4, 1], strides = [1, 1]} : vector<4x4xf32> to vector<4x1xf32>
      %294 = vector.extract_strided_slice %272 {offsets = [3, 0], sizes = [1, 256], strides = [1, 1]} : vector<4x256xf32> to vector<1x256xf32>
      %295 = vector.broadcast %293 : vector<4x1xf32> to vector<4x256xf32>
      %296 = vector.broadcast %294 : vector<1x256xf32> to vector<4x256xf32>
      %297 = arith.mulf %295, %296 : vector<4x256xf32>
      %298 = arith.addf %292, %297 : vector<4x256xf32>
      %299 = arith.index_cast %arg1 : i32 to index
      %c0_47 = arith.constant 0 : index
      %c0_48 = arith.constant 0 : index
      %300 = vector.load %arg8[%299, %c0_47, %c0_48] : memref<2x4x256xf32, #tpu.memory_space<vmem>>, vector<1x4x256xf32>
      %301 = vector.shape_cast %300 : vector<1x4x256xf32> to vector<4x256xf32>
      %302 = vector.shape_cast %298 : vector<4x256xf32> to vector<1x4x256xf32>
      tpu.vector_store %arg8[%299, %c0_47, %c0_48], %302 {strides = array<i32>} : memref<2x4x256xf32, #tpu.memory_space<vmem>>, vector<1x4x256xf32>,
      %303 = arith.index_cast %arg1 : i32 to index
      %c0_49 = arith.constant 0 : index
      %c0_50 = arith.constant 0 : index
      %304 = vector.load %arg9[%303, %c0_49, %c0_50] : memref<2x4x256xf32, #tpu.memory_space<vmem>>, vector<1x4x256xf32>
      %305 = vector.shape_cast %304 : vector<1x4x256xf32> to vector<4x256xf32>
      %306 = vector.shape_cast %7 : vector<4x256xf32> to vector<1x4x256xf32>
      tpu.vector_store %arg9[%303, %c0_49, %c0_50], %306 {strides = array<i32>} : memref<2x4x256xf32, #tpu.memory_space<vmem>>, vector<1x4x256xf32>,
    } else {
    }
    %c1_i32 = arith.constant 1 : i32
    %3 = arith.cmpi eq, %arg0, %c1_i32 : i32
    %4 = arith.extui %3 : i1 to i32
    %c0_i32_1 = arith.constant 0 : i32
    %5 = arith.cmpi ne, %4, %c0_i32_1 : i32
    scf.if %5 {
      %c0_i32_2 = arith.constant 0 : i32
      %6 = arith.cmpi eq, %arg1, %c0_i32_2 : i32
      %7 = arith.extui %6 : i1 to i32
      %c0_i32_3 = arith.constant 0 : i32
      %8 = arith.cmpi ne, %7, %c0_i32_3 : i32
      scf.if %8 {
        %cst = arith.constant 0.000000e+00 : f32
        %25 = vector.broadcast %cst : f32 to vector<4x1xf32>
        %c0_14 = arith.constant 0 : index
        %c0_15 = arith.constant 0 : index
        %c0_16 = arith.constant 0 : index
        %26 = vector.load %arg8[%c0_14, %c0_15, %c0_16] : memref<2x4x256xf32, #tpu.memory_space<vmem>>, vector<1x4x256xf32>
        %27 = vector.shape_cast %26 : vector<1x4x256xf32> to vector<4x256xf32>
        %cst_17 = arith.constant dense<0.000000e+00> : vector<4xf32>
        %28 = vector.multi_reduction <add>, %27, %cst_17 [1] : vector<4x256xf32> to vector<4xf32>
        %29 = vector.shape_cast %28 : vector<4xf32> to vector<4x1xf32>
        %30 = arith.addf %25, %29 : vector<4x1xf32>
        %c1 = arith.constant 1 : index
        %c0_18 = arith.constant 0 : index
        %c0_19 = arith.constant 0 : index
        %31 = vector.load %arg8[%c1, %c0_18, %c0_19] : memref<2x4x256xf32, #tpu.memory_space<vmem>>, vector<1x4x256xf32>
        %32 = vector.shape_cast %31 : vector<1x4x256xf32> to vector<4x256xf32>
        %cst_20 = arith.constant dense<0.000000e+00> : vector<4xf32>
        %33 = vector.multi_reduction <add>, %32, %cst_20 [1] : vector<4x256xf32> to vector<4xf32>
        %34 = vector.shape_cast %33 : vector<4xf32> to vector<4x1xf32>
        %35 = arith.addf %30, %34 : vector<4x1xf32>
        %cst_21 = arith.constant 5.120000e+02 : f32
        %36 = vector.broadcast %cst_21 : f32 to vector<4x1xf32>
        %37 = arith.divf %35, %36 : vector<4x1xf32>
        %cst_22 = arith.constant 0.000000e+00 : f32
        %38 = vector.broadcast %cst_22 : f32 to vector<4x1xf32>
        %c0_23 = arith.constant 0 : index
        %c0_24 = arith.constant 0 : index
        %c0_25 = arith.constant 0 : index
        %39 = vector.load %arg8[%c0_23, %c0_24, %c0_25] : memref<2x4x256xf32, #tpu.memory_space<vmem>>, vector<1x4x256xf32>
        %40 = vector.shape_cast %39 : vector<1x4x256xf32> to vector<4x256xf32>
        %41 = vector.broadcast %37 : vector<4x1xf32> to vector<4x256xf32>
        %42 = arith.subf %40, %41 : vector<4x256xf32>
        %43 = arith.mulf %42, %42 : vector<4x256xf32>
        %cst_26 = arith.constant dense<0.000000e+00> : vector<4xf32>
        %44 = vector.multi_reduction <add>, %43, %cst_26 [1] : vector<4x256xf32> to vector<4xf32>
        %45 = vector.shape_cast %44 : vector<4xf32> to vector<4x1xf32>
        %46 = arith.addf %38, %45 : vector<4x1xf32>
        %c1_27 = arith.constant 1 : index
        %c0_28 = arith.constant 0 : index
        %c0_29 = arith.constant 0 : index
        %47 = vector.load %arg8[%c1_27, %c0_28, %c0_29] : memref<2x4x256xf32, #tpu.memory_space<vmem>>, vector<1x4x256xf32>
        %48 = vector.shape_cast %47 : vector<1x4x256xf32> to vector<4x256xf32>
        %49 = vector.broadcast %37 : vector<4x1xf32> to vector<4x256xf32>
        %50 = arith.subf %48, %49 : vector<4x256xf32>
        %51 = arith.mulf %50, %50 : vector<4x256xf32>
        %cst_30 = arith.constant dense<0.000000e+00> : vector<4xf32>
        %52 = vector.multi_reduction <add>, %51, %cst_30 [1] : vector<4x256xf32> to vector<4xf32>
        %53 = vector.shape_cast %52 : vector<4xf32> to vector<4x1xf32>
        %54 = arith.addf %46, %53 : vector<4x1xf32>
        %cst_31 = arith.constant 5.120000e+02 : f32
        %55 = vector.broadcast %cst_31 : f32 to vector<4x1xf32>
        %56 = arith.divf %54, %55 : vector<4x1xf32>
        %c0_32 = arith.constant 0 : index
        %c0_33 = arith.constant 0 : index
        %57 = vector.load %arg5[%c0_32, %c0_33] : memref<4x1xf32, #tpu.memory_space<vmem>>, vector<4x1xf32>
        %cst_34 = arith.constant 9.99999974E-6 : f32
        %58 = vector.broadcast %cst_34 : f32 to vector<4x1xf32>
        %59 = arith.addf %56, %58 : vector<4x1xf32>
        %60 = math.rsqrt %59 : vector<4x1xf32>
        %61 = arith.mulf %57, %60 : vector<4x1xf32>
        %c0_35 = arith.constant 0 : index
        %c0_36 = arith.constant 0 : index
        %62 = vector.load %arg10[%c0_35, %c0_36] : memref<4x1xf32, #tpu.memory_space<vmem>>, vector<4x1xf32>
        tpu.vector_store %arg10[%c0_35, %c0_36], %61 {strides = array<i32>} : memref<4x1xf32, #tpu.memory_space<vmem>>, vector<4x1xf32>,
        %c0_37 = arith.constant 0 : index
        %c0_38 = arith.constant 0 : index
        %63 = vector.load %arg6[%c0_37, %c0_38] : memref<4x1xf32, #tpu.memory_space<vmem>>, vector<4x1xf32>
        %64 = arith.mulf %37, %61 : vector<4x1xf32>
        %65 = arith.subf %63, %64 : vector<4x1xf32>
        %c0_39 = arith.constant 0 : index
        %c0_40 = arith.constant 0 : index
        %66 = vector.load %arg11[%c0_39, %c0_40] : memref<4x1xf32, #tpu.memory_space<vmem>>, vector<4x1xf32>
        tpu.vector_store %arg11[%c0_39, %c0_40], %65 {strides = array<i32>} : memref<4x1xf32, #tpu.memory_space<vmem>>, vector<4x1xf32>,
      } else {
      }
      %9 = arith.index_cast %arg1 : i32 to index
      %c0 = arith.constant 0 : index
      %c0_4 = arith.constant 0 : index
      %10 = vector.load %arg9[%9, %c0, %c0_4] : memref<2x4x256xf32, #tpu.memory_space<vmem>>, vector<1x4x256xf32>
      %11 = vector.shape_cast %10 : vector<1x4x256xf32> to vector<4x256xf32>
      %12 = arith.index_cast %arg1 : i32 to index
      %c0_5 = arith.constant 0 : index
      %c0_6 = arith.constant 0 : index
      %13 = vector.load %arg8[%12, %c0_5, %c0_6] : memref<2x4x256xf32, #tpu.memory_space<vmem>>, vector<1x4x256xf32>
      %14 = vector.shape_cast %13 : vector<1x4x256xf32> to vector<4x256xf32>
      %c0_7 = arith.constant 0 : index
      %c0_8 = arith.constant 0 : index
      %15 = vector.load %arg10[%c0_7, %c0_8] : memref<4x1xf32, #tpu.memory_space<vmem>>, vector<4x1xf32>
      %16 = vector.broadcast %15 : vector<4x1xf32> to vector<4x256xf32>
      %17 = arith.mulf %14, %16 : vector<4x256xf32>
      %18 = arith.addf %11, %17 : vector<4x256xf32>
      %c0_9 = arith.constant 0 : index
      %c0_10 = arith.constant 0 : index
      %19 = vector.load %arg11[%c0_9, %c0_10] : memref<4x1xf32, #tpu.memory_space<vmem>>, vector<4x1xf32>
      %20 = vector.broadcast %19 : vector<4x1xf32> to vector<4x256xf32>
      %21 = arith.addf %18, %20 : vector<4x256xf32>
      %c0_11 = arith.constant 0 : index
      %c0_12 = arith.constant 0 : index
      %c0_13 = arith.constant 0 : index
      %22 = vector.load %arg7[%c0_11, %c0_12, %c0_13] : memref<1x4x256xf32, #tpu.memory_space<vmem>>, vector<1x4x256xf32>
      %23 = vector.shape_cast %22 : vector<1x4x256xf32> to vector<4x256xf32>
      %24 = vector.shape_cast %21 : vector<4x256xf32> to vector<1x4x256xf32>
      tpu.vector_store %arg7[%c0_11, %c0_12, %c0_13], %24 {strides = array<i32>} : memref<1x4x256xf32, #tpu.memory_space<vmem>>, vector<1x4x256xf32>,
    } else {
    }
    return
  }
  func.func @transform_0(%arg0: i32, %arg1: i32) -> (i32, i32, i32) {
    %c1_i32 = arith.constant 1 : i32
    %0 = arith.subi %c1_i32, %arg0 : i32
    %1 = arith.muli %0, %arg1 : i32
    %c0_i32 = arith.constant 0 : i32
    %c0_i32_0 = arith.constant 0 : i32
    %c0_i32_1 = arith.constant 0 : i32
    return %1, %c0_i32, %c0_i32_0 : i32, i32, i32
  }
  func.func @transform_1(%arg0: i32, %arg1: i32) -> (i32, i32, i32) {
    %c0_i32 = arith.constant 0 : i32
    %c0_i32_0 = arith.constant 0 : i32
    %c0_i32_1 = arith.constant 0 : i32
    %c0_i32_2 = arith.constant 0 : i32
    return %c0_i32, %c0_i32_0, %c0_i32_1 : i32, i32, i32
  }
  func.func @transform_2(%arg0: i32, %arg1: i32) -> (i32, i32, i32) {
    %c0_i32 = arith.constant 0 : i32
    %c0_i32_0 = arith.constant 0 : i32
    %c0_i32_1 = arith.constant 0 : i32
    %c0_i32_2 = arith.constant 0 : i32
    return %c0_i32, %c0_i32_0, %c0_i32_1 : i32, i32, i32
  }
  func.func @transform_3(%arg0: i32, %arg1: i32) -> (i32, i32) {
    %c0_i32 = arith.constant 0 : i32
    %c0_i32_0 = arith.constant 0 : i32
    %c0_i32_1 = arith.constant 0 : i32
    return %c0_i32, %c0_i32_0 : i32, i32
  }
  func.func @transform_4(%arg0: i32, %arg1: i32) -> (i32, i32) {
    %c0_i32 = arith.constant 0 : i32
    %c0_i32_0 = arith.constant 0 : i32
    %c0_i32_1 = arith.constant 0 : i32
    return %c0_i32, %c0_i32_0 : i32, i32
  }
  func.func @transform_5(%arg0: i32, %arg1: i32) -> (i32, i32, i32) {
    %0 = arith.muli %arg0, %arg1 : i32
    %c0_i32 = arith.constant 0 : i32
    %c0_i32_0 = arith.constant 0 : i32
    %c0_i32_1 = arith.constant 0 : i32
    return %0, %c0_i32, %c0_i32_0 : i32, i32, i32
  }
}

</mosaic_0001>

<bundles_post_ra>
// kernel: _forward.1
= control target key start
LH: loop header
LB: loop body
LE: loop exit
PB: predicated region body
PF: predicated region fallthrough
CT: control target
= control target key end

     0   :  { %s1523_s18 = smov 0   ;;  %s1525_s19 = smov 0   ;;  %s1832_s0 = inlined_call_operand.vmem [shape: f32[2,4,256], index: 0, kind: input, shape index: {}]   ;;  %s1833_s1 = inlined_call_operand.vmem [shape: f32[9,4,4], index: 1, kind: input, shape index: {}]   ;;  %s1834_s2 = inlined_call_operand.vmem [shape: f32[9,1,256], index: 2, kind: input, shape index: {}]   ;;  %s1835_s3 = inlined_call_operand.vmem [shape: f32[4,1], index: 3, kind: input, shape index: {}]   ;;  %s1836_s4 = inlined_call_operand.vmem [shape: f32[4,1], index: 4, kind: input, shape index: {}]   ;;  %s1837_s5 = inlined_call_operand.vmem [shape: f32[2,4,256], index: 5, kind: output, shape index: {}]  }
   0x1   :  { %s1527_s20 = smov 0   ;;  %s1529_s21 = smov 0  }
   0x2   :  { %s1531_s22 = smov 0  }
   0x3 LB: > { %s24_s23 = sadd.s32 1, %s1468_s20  ;;  %s27_s24 = sadd.s32 1, %s1472_s21  ;;  %s1476_s22 = sphi %s1531_s22, %s15_s22   ;;  %s1472_s21 = sphi %s1529_s21, %s1841_s21   ;;  %s1468_s20 = sphi %s1527_s20, %s1840_s20   ;;  %s1464_s19 = sphi %s1525_s19, %s1839_s19   ;;  %s1460_s18 = sphi %s1523_s18, %s1838_s18  }
   0x4   : > { %p25_p0 = scmp.ge.s32.totalorder %s24_s23, 2  ;;  %p1308_p1 = scmp.ge.s32.totalorder %s1476_s22, 1 }
   0x5   : > { %p209_p2 = scmp.lt.s32.totalorder %s1476_s22, 5 }
   0x6   : > { %s1843_s23 = smov (%p25_p0, %s24_s23), 0  ;;  %s1845_s24 = smov (!%p25_p0, %s27_s24), %s1472_s21 }
   0x7   : > { %p210_p3 = pnand %p1308_p1, %p209_p2  ;;  %p29_p4 = scmp.ge.s32.totalorder %s1845_s24, 2 }
   0x8   : > { %s240_s25 = ssub.s32 (!%p210_p3), 1, %s1464_s19  ;;  %s249_s26 = smul.u32 (!%p210_p3), %s1460_s18, %s1464_s19 }
   0x9   : > { %s1847_s24 = smov (%p29_p4, %s1845_s24), 0  ;;  %213 = sbr.rel (%p210_p3) target bundleno = 775 (0x307), region = 40 }
   0xa   : > { %s241_s27 = smul.u32 (!%p210_p3), %s1460_s18, %s240_s25  ;;  %p250_p5 = scmp.lt.s32.totalorder (!%p210_p3), %s249_s26, 1 }
   0xb   : > { %p1313_p7 = scmp.ne.s32.totalorder (!%p210_p3), %s1464_s19, 0 }
   0xc   : > { %p242_p6 = scmp.lt.s32.totalorder (!%p210_p3), %s241_s27, 1 }
   0xe   : > { %s1849_s26 = smov (!%p250_p5, %s249_s26), 1  ;;  %s1851_s27 = smov (!%p242_p6, %s241_s27), 1 }
   0xf   : > { %s1340_s28 = sshll.u32 %s1849_s26, 3  ;;  %s1339_s29 = sshll.u32 %s1851_s27, 3 }
  0x10   : > { %s1564_s7 = scalar_lea.vmem %s1837_s5, %s1340_s28  ;;  %s246_s10 = scalar_lea.vmem %s1832_s0, %s1339_s29 }
  0x11   : > { %259 = sbr.rel (%p1313_p7) target bundleno = 295 (0x127), region = 44  ;;  %s1480_s13 = smov (!%p1313_p7), 17  }
  0x12   : > { %s1483_s14 = smov (!%p1313_p7), 16   ;;  %s1484_s17 = smov (!%p1313_p7), 15  }
  0x13   : > { %s1485_s6 = smov (!%p1313_p7), 1   ;;  %s1486_s8 = smov (!%p1313_p7), 127  }
  0x14   : > { %s1487_s11 = smov (!%p1313_p7), 113   ;;  %s1488_s25 = smov (!%p1313_p7), 112  }
  0x15   : > { %s1489_s26 = smov (!%p1313_p7), 111   ;;  %s1341_s27 = sshll.u32 (!%p1313_p7), %s1460_s18, 3 }
  0x16   : > { %v287_v0 = vld [vmem:[%s1833_s1] sm:$0xf]  ;;  %v1478_v2 = vmov 0   ;;  %v1479_v4 = vmov 2   ;;  %v1481_v5 = vmov 1   ;;  %v1482_v6 = vmov 3  }
  0x17   : > { %v1573_v1 = vld [vmem:[%s246_s10] sm:$0xff]  ;;  %1400 = vset.pattern.permute.xlu1 %v1478_v2  ;;  %1402 = vset.pattern.permute.xlu0 %v1479_v4  ;;  %v1317_v8 = vld [vmem:[%s1833_s1 + $0x8] sm:$0xf]  ;;  %v1319_v9 = vld [vmem:[%s1833_s1 + $0xc] sm:$0xf]  ;;  %v275_v16 = vlaneseq  ;;  %s1113_s30 = scalar_lea.vmem [#allocation3], %s1341_s27 }
  0x18   : > { %v1578_v3 = vcombine.high %v1573_v1, %v1573_v1  ;;  %290 = vperm.xlu1 %1400, %v287_v0   ;;  %v1315_v7 = vld [vmem:[%s1833_s1 + $0x4] sm:$0xf]  ;;  %v1320_v10 = vld [vmem:[%s1833_s1 + $0x10] sm:$0xf]  ;;  %v1322_v11 = vld [vmem:[%s1833_s1 + $0x14] sm:$0xf]  ;;  %1114 = vst [vmem:[%s1113_s30] sm:$0xff] %v1573_v1 }
  0x19   : > { %v1324_v12 = vld [vmem:[%s1833_s1 + $0x18] sm:$0xf]  ;;  %v1326_v13 = vld [vmem:[%s1833_s1 + $0x1c] sm:$0xf]  ;;  %v1328_v14 = vld [vmem:[%s1833_s1 + $0x20] sm:$0xf] }
  0x1a   : > { %263 = vrot.lane.b32.xlu0 %v1578_v3, %s1480_s13  ;;  %v1650_v19 = vshrl.u32 %v275_v16, 7  ;;  %v273_v24 = vld [vmem:[%s1834_s2] sm:$0x3]  ;;  %vm268_vm0 = vcmask 138240   ;;  %v1314_v35 = vld [vmem:[%s1834_s2 + $0x2] sm:$0x3] }
  0x1b   : > { %vm358_vm1 = vcmask 130048   ;;  %vm450_vm2 = vcmask 121856   ;;  %vm542_vm3 = vcmask 7168   ;;  %vm740_vm4 = vcmask 1039360   ;;  %s1110_s29 = scalar_lea.vmem [#allocation2], %s1341_s27 }
  0x1c   : > { %1401 = vset.pattern.permute.xlu1 %v1481_v5  ;;  %v1654_v21 = vsub.s32 0, %v1650_v19  ;;  %v1657_v22 = vsub.s32 1, %v1650_v19  ;;  %v1669_v34 = vsub.s32 2, %v1650_v19  ;;  %v1677_v39 = vsub.s32 3, %v1650_v19 }
  0x1d   : > { %306 = vperm.xlu1 %1401, %v287_v0   ;;  %vm832_vm5 = vcmask 924672   ;;  %vm924_vm6 = vcmask 916480   ;;  %vm1016_vm7 = vcmask 908288  }
  0x1e   : > { %266 = vrot.lane.b32.xlu0 %v1573_v1, %s1480_s13  ;;  %v278_v26 = vrot.slane %v273_v24, %v1654_v21  ;;  %v282_v27 = vrot.slane %v273_v24, %v1657_v22  ;;  %v369_v43 = vrot.slane %v1314_v35, %v1654_v21  ;;  %v373_v44 = vrot.slane %v1314_v35, %v1657_v22 }
  0x21   : > { %1403 = vset.pattern.permute.xlu1 %v1482_v6 }
  0x22   : > { %322 = vperm.xlu0 %1402, %v287_v0   ;;  %338 = vperm.xlu1 %1403, %v287_v0  }
  0x26   : > { %356 = vrot.lane.b32.xlu0 %v1573_v1, %s1483_s14  ;;  %353 = vrot.lane.b32.xlu1 %v1578_v3, %s1483_s14 }
  0x27   : > { %1405 = vset.pattern.permute.xlu0 %v1481_v5  ;;  %1404 = vset.pattern.permute.xlu1 %v1478_v2 }
  0x2a   : > { %398 = vperm.xlu0 %1405, %v1315_v7   ;;  %382 = vperm.xlu1 %1404, %v1315_v7  }
  0x2e   : > { %445 = vrot.lane.b32.xlu0 %v1578_v3, %s1484_s17  ;;  %1406 = vset.pattern.permute.xlu1 %v1479_v4 }
  0x2f   : > { %1408 = vset.pattern.permute.xlu0 %v1478_v2  ;;  %414 = vperm.xlu1 %1406, %v1315_v7  }
  0x32   : > { %474 = vperm.xlu0 %1408, %v1317_v8  }
  0x33   : > { %1407 = vset.pattern.permute.xlu1 %v1482_v6 }
  0x34   : > { %430 = vperm.xlu1 %1407, %v1315_v7   ;;  %v1316_v7 = vld [vmem:[%s1834_s2 + $0x4] sm:$0x3] }
  0x36   : > { %566 = vperm.xlu0 %1408, %v1319_v9  }
  0x38   : > { %448 = vrot.lane.b32.xlu1 %v1573_v1, %s1484_s17 }
  0x39   : > { %1409 = vset.pattern.permute.xlu1 %v1481_v5 }
  0x3a   : > { %1411 = vset.pattern.permute.xlu0 %v1482_v6 }
  0x3b   : > { %522 = vperm.xlu0 %1411, %v1317_v8  }
  0x3c   : > { %490 = vperm.xlu1 %1409, %v1317_v8  }
  0x3f   : > { %614 = vperm.xlu0 %1411, %v1319_v9  }
  0x40   : > { %1410 = vset.pattern.permute.xlu1 %v1479_v4 }
  0x41   : > { %506 = vperm.xlu1 %1410, %v1317_v8  }
  0x43   : > { %1416 = vset.pattern.permute.xlu0 %v1479_v4 }
  0x44   : > { %685 = vperm.xlu0 %1416, %v1320_v10  }
  0x45   : > { %537 = vrot.lane.b32.xlu1 %v1578_v3, %s1485_s6 }
  0x46   : > { %1412 = vset.pattern.permute.xlu1 %v1481_v5 }
  0x48   : > { %738 = vrot.lane.b32.xlu0 %v1578_v3, %s1486_s8 }
  0x49   : > { %1419 = vset.pattern.permute.xlu0 %v1481_v5  ;;  %540 = vrot.lane.b32.xlu1 %v1573_v1, %s1485_s6 }
  0x4c   : > { %781 = vperm.xlu0 %1419, %v1322_v11  }
  0x4d   : > { %582 = vperm.xlu1 %1412, %v1319_v9  }
  0x50   : > { %828 = vrot.lane.b32.xlu0 %v1573_v1, %s1487_s11 }
  0x51   : > { %1422 = vset.pattern.permute.xlu0 %v1478_v2  ;;  %1413 = vset.pattern.permute.xlu1 %v1479_v4 }
  0x52   : > { %598 = vperm.xlu1 %1413, %v1319_v9  }
  0x54   : > { %857 = vperm.xlu0 %1422, %v1324_v12  }
  0x56   : > { %1414 = vset.pattern.permute.xlu1 %v1478_v2 }
  0x57   : > { %633 = vperm.xlu1 %1414, %v1320_v10  }
  0x58   : > { %949 = vperm.xlu0 %1422, %v1326_v13  }
  0x5b   : > { %1415 = vset.pattern.permute.xlu1 %v1481_v5 }
  0x5c   : > { %1425 = vset.pattern.permute.xlu0 %v1482_v6  ;;  %659 = vperm.xlu1 %1415, %v1320_v10  }
  0x5d   : > { %905 = vperm.xlu0 %1425, %v1324_v12  }
  0x60   : > { %1417 = vset.pattern.permute.xlu1 %v1482_v6 }
  0x61   : > { %997 = vperm.xlu0 %1425, %v1326_v13   ;;  %711 = vperm.xlu1 %1417, %v1320_v10  }
  0x65   : > { %1428 = vset.pattern.permute.xlu0 %v1478_v2  ;;  %736 = vrot.lane.b32.xlu1 %v1573_v1, %s1486_s8 }
  0x66   : > { %1041 = vperm.xlu0 %1428, %v1328_v14   ;;  %1418 = vset.pattern.permute.xlu1 %v1478_v2 }
  0x69   : > { %765 = vperm.xlu1 %1418, %v1322_v11  }
  0x6a   : > { %1431 = vset.pattern.permute.xlu0 %v1482_v6 }
  0x6b   : > { %1089 = vperm.xlu0 %1431, %v1328_v14  }
  0x6d   : > { %1420 = vset.pattern.permute.xlu1 %v1479_v4 }
  0x6e   : > { %797 = vperm.xlu1 %1420, %v1322_v11  }
  0x72   : > { %1421 = vset.pattern.permute.xlu1 %v1482_v6 }
  0x73   : > { %813 = vperm.xlu1 %1421, %v1322_v11  }
  0x77   : > { %830 = vrot.lane.b32.xlu1 %v1578_v3, %s1487_s11 }
  0x78   : > { %1423 = vset.pattern.permute.xlu1 %v1481_v5 }
  0x7b   : > { %873 = vperm.xlu1 %1423, %v1324_v12  }
  0x7f   : > { %1424 = vset.pattern.permute.xlu1 %v1479_v4 }
  0x80   : > { %889 = vperm.xlu1 %1424, %v1324_v12  }
  0x84   : > { %920 = vrot.lane.b32.xlu1 %v1573_v1, %s1488_s25 }
  0x85   : > { %1426 = vset.pattern.permute.xlu1 %v1481_v5 }
  0x88   : > { %922 = vrot.lane.b32.xlu1 %v1578_v3, %s1488_s25 }
  0x8c   : > { %965 = vperm.xlu1 %1426, %v1326_v13   ;;  %v264_v18 = vpop.permute.xlu0 %263 }
  0x90   : > { %1427 = vset.pattern.permute.xlu1 %v1479_v4  ;;  %v267_v23 = vpop.permute.xlu0 %266 }
  0x91   : > { %981 = vperm.xlu1 %1427, %v1326_v13   ;;  %v269_v29 = vsel %vm268_vm0, %v267_v23, %v264_v18  ;;  %v272_v30 = vsel %vm268_vm0, %v264_v18, %v267_v23 }
  0x92   : > { %v285_v32 = vmul.f32 %v278_v26, %v272_v30  ;;  %v286_v33 = vmul.f32 %v282_v27, %v269_v29 }
  0x93   : > { %v291_v15 = vpop.permute.xlu1 %290 }
  0x94   : > { %v312_v37 = vrot.slane %v285_v32, %v1657_v22  ;;  %v316_v38 = vrot.slane %v286_v33, %v1657_v22  ;;  %v296_v41 = vrot.slane %v285_v32, %v1654_v21  ;;  %v300_v42 = vrot.slane %v286_v33, %v1654_v21 }
  0x95   : > { %1012 = vrot.lane.b32.xlu1 %v1573_v1, %s1489_s26  ;;  %v328_v45 = vrot.slane %v285_v32, %v1669_v34  ;;  %v332_v46 = vrot.slane %v286_v33, %v1669_v34  ;;  %v344_v51 = vrot.slane %v285_v32, %v1677_v39  ;;  %v348_v52 = vrot.slane %v286_v33, %v1677_v39 }
  0x96   : > { %1429 = vset.pattern.permute.xlu1 %v1481_v5  ;;  %v301_v56 = vmul.f32 %v296_v41, %v291_v15  ;;  %v302_v57 = vmul.f32 %v300_v42, %v291_v15  ;;  %v465_v15 = vrot.slane %v1316_v7, %v1657_v22 }
  0x98   : > { %v307_v17 = vpop.permute.xlu1 %306 }
  0x99   : > { %1014 = vrot.lane.b32.xlu1 %v1578_v3, %s1489_s26  ;;  %v317_v49 = vmul.f32 %v312_v37, %v307_v17  ;;  %v318_v50 = vmul.f32 %v316_v38, %v307_v17 }
  0x9b   : > { %v319_v60 = vadd.f32 %v317_v49, %v301_v56  ;;  %v320_v61 = vadd.f32 %v318_v50, %v302_v57 }
  0x9d   : > { %v339_v20 = vpop.permute.xlu1 %338  ;;  %1057 = vperm.xlu1 %1429, %v1328_v14   ;;  %v323_v28 = vpop.permute.xlu0 %322 }
  0x9e   : > { %v333_v58 = vmul.f32 %v328_v45, %v323_v28  ;;  %v334_v59 = vmul.f32 %v332_v46, %v323_v28  ;;  %v350_v5 = vmul.f32 %v348_v52, %v339_v20  ;;  %v1318_v46 = vld [vmem:[%s1834_s2 + $0x6] sm:$0x3] }
  0xa0   : > { %v335_v2 = vadd.f32 %v333_v58, %v319_v60  ;;  %v336_v3 = vadd.f32 %v334_v59, %v320_v61 }
  0xa1   : > { %1430 = vset.pattern.permute.xlu1 %v1479_v4  ;;  %v354_v25 = vpop.permute.xlu1 %353  ;;  %v357_v36 = vpop.permute.xlu0 %356  ;;  %v349_v4 = vmul.f32 %v344_v51, %v339_v20 }
  0xa2   : > { %1073 = vperm.xlu1 %1430, %v1328_v14   ;;  %v359_v47 = vsel %vm358_vm1, %v357_v36, %v354_v25  ;;  %v362_v48 = vsel %vm358_vm1, %v354_v25, %v357_v36  ;;  %v352_v12 = vadd.f32 %v350_v5, %v336_v3  ;;  %v461_v14 = vrot.slane %v1316_v7, %v1654_v21 }
  0xa3   : > { %v376_v53 = vmul.f32 %v369_v43, %v362_v48  ;;  %v377_v54 = vmul.f32 %v373_v44, %v359_v47  ;;  %v351_v11 = vadd.f32 %v349_v4, %v335_v2 }
  0xa5   : > { %v383_v31 = vpop.permute.xlu1 %382  ;;  %v388_v62 = vrot.slane %v376_v53, %v1654_v21  ;;  %v392_v63 = vrot.slane %v377_v54, %v1654_v21  ;;  %v399_v6 = vpop.permute.xlu0 %398  ;;  %v404_v16 = vrot.slane %v376_v53, %v1657_v22  ;;  %v408_v17 = vrot.slane %v377_v54, %v1657_v22 }
  0xa6   : > { %v420_v30 = vrot.slane %v376_v53, %v1669_v34  ;;  %v436_v35 = vrot.slane %v376_v53, %v1677_v39  ;;  %v440_v36 = vrot.slane %v377_v54, %v1677_v39  ;;  %v557_v53 = vrot.slane %v1318_v46, %v1657_v22 }
  0xa7   : > { %v393_v8 = vmul.f32 %v388_v62, %v383_v31  ;;  %v394_v9 = vmul.f32 %v392_v63, %v383_v31  ;;  %v409_v28 = vmul.f32 %v404_v16, %v399_v6  ;;  %v410_v29 = vmul.f32 %v408_v17, %v399_v6 }
  0xa8   : > { %v424_v31 = vrot.slane %v377_v54, %v1669_v34 }
  0xa9   : > { %v446_v13 = vpop.permute.xlu0 %445  ;;  %v395_v23 = vadd.f32 %v393_v8, %v351_v11  ;;  %v396_v24 = vadd.f32 %v394_v9, %v352_v12 }
  0xaa   : > { %v415_v40 = vpop.permute.xlu1 %414 }
  0xab   : > { %v411_v32 = vadd.f32 %v409_v28, %v395_v23  ;;  %v412_v33 = vadd.f32 %v410_v29, %v396_v24  ;;  %v425_v37 = vmul.f32 %v420_v30, %v415_v40  ;;  %v426_v38 = vmul.f32 %v424_v31, %v415_v40 }
  0xac   : > { %v553_v40 = vrot.slane %v1318_v46, %v1654_v21 }
  0xad   : > { %v475_v47 = vpop.permute.xlu0 %474  ;;  %v427_v48 = vadd.f32 %v425_v37, %v411_v32  ;;  %v428_v49 = vadd.f32 %v426_v38, %v412_v33 }
  0xaf   : > { %v431_v55 = vpop.permute.xlu1 %430 }
  0xb0   : > { %v441_v44 = vmul.f32 %v436_v35, %v431_v55  ;;  %v442_v45 = vmul.f32 %v440_v36, %v431_v55  ;;  %v668_v35 = vsub.s32 5, %v1650_v19 }
  0xb1   : > { %v567_v63 = vpop.permute.xlu0 %566 }
  0xb2   : > { %v443_v54 = vadd.f32 %v441_v44, %v427_v48  ;;  %v444_v56 = vadd.f32 %v442_v45, %v428_v49  ;;  %v639_v44 = vrot.slane %v1573_v1, %v1654_v21 }
  0xb3   : > { %v449_v0 = vpop.permute.xlu1 %448 }
  0xb4   : > { %v451_v18 = vsel %vm450_vm2, %v449_v0, %v446_v13  ;;  %v454_v20 = vsel %vm450_vm2, %v446_v13, %v449_v0 }
  0xb5   : > { %v468_v25 = vmul.f32 %v461_v14, %v454_v20  ;;  %v469_v26 = vmul.f32 %v465_v15, %v451_v18 }
  0xb6   : > { %v523_v17 = vpop.permute.xlu0 %522 }
  0xb7   : > { %v491_v10 = vpop.permute.xlu1 %490  ;;  %v480_v41 = vrot.slane %v468_v25, %v1654_v21  ;;  %v484_v42 = vrot.slane %v469_v26, %v1654_v21  ;;  %v496_v57 = vrot.slane %v468_v25, %v1657_v22  ;;  %v500_v55 = vrot.slane %v469_v26, %v1657_v22 }
  0xb8   : > { %v512_v0 = vrot.slane %v468_v25, %v1669_v34  ;;  %v516_v2 = vrot.slane %v469_v26, %v1669_v34  ;;  %v528_v13 = vrot.slane %v468_v25, %v1677_v39  ;;  %v532_v14 = vrot.slane %v469_v26, %v1677_v39 }
  0xb9   : > { %v485_v50 = vmul.f32 %v480_v41, %v475_v47  ;;  %v486_v51 = vmul.f32 %v484_v42, %v475_v47  ;;  %v501_v3 = vmul.f32 %v496_v57, %v491_v10  ;;  %v502_v4 = vmul.f32 %v500_v55, %v491_v10 }
  0xba   : > { %v533_v23 = vmul.f32 %v528_v13, %v523_v17  ;;  %v534_v10 = vmul.f32 %v532_v14, %v523_v17  ;;  %v642_v26 = vsub.s32 4, %v1650_v19  ;;  %v615_v41 = vpop.permute.xlu0 %614  ;;  %v717_v14 = vrot.slane %v1573_v1, %v1677_v39 }
  0xbb   : > { %v487_v60 = vadd.f32 %v485_v50, %v443_v54  ;;  %v488_v61 = vadd.f32 %v486_v51, %v444_v56  ;;  %v665_v50 = vrot.slane %v1573_v1, %v1657_v22  ;;  %v669_v51 = vrot.slane %v1573_v1, %v668_v35 }
  0xbc   : > { %v507_v27 = vpop.permute.xlu1 %506  ;;  %v643_v45 = vrot.slane %v1573_v1, %v642_v26 }
  0xbd   : > { %v503_v7 = vadd.f32 %v501_v3, %v487_v60  ;;  %v504_v8 = vadd.f32 %v502_v4, %v488_v61  ;;  %v517_v9 = vmul.f32 %v512_v0, %v507_v27  ;;  %v518_v11 = vmul.f32 %v516_v2, %v507_v27  ;;  %v1321_v60 = vld [vmem:[%s1834_s2 + $0xa] sm:$0x3] }
  0xbe   : > { %v675_v61 = vrot.slane %v665_v50, %v1657_v22  ;;  %v720_v0 = vsub.s32 7, %v1650_v19 }
  0xbf   : > { %v519_v18 = vadd.f32 %v517_v9, %v503_v7  ;;  %v520_v20 = vadd.f32 %v518_v11, %v504_v8  ;;  %v686_v54 = vpop.permute.xlu0 %685  ;;  %v752_v7 = vrot.slane %v1321_v60, %v1654_v21  ;;  %v756_v8 = vrot.slane %v1321_v60, %v1657_v22 }
  0xc0   : > { %v538_v43 = vpop.permute.xlu1 %537 }
  0xc1   : > { %v535_v30 = vadd.f32 %v533_v23, %v519_v18  ;;  %v536_v31 = vadd.f32 %v534_v10, %v520_v20 }
  0xc4   : > { %v541_v52 = vpop.permute.xlu1 %540 }
  0xc5   : > { %v543_v58 = vsel %vm542_vm3, %v541_v52, %v538_v43  ;;  %v546_v59 = vsel %vm542_vm3, %v538_v43, %v541_v52 }
  0xc6   : > { %v560_v5 = vmul.f32 %v553_v40, %v546_v59  ;;  %v561_v6 = vmul.f32 %v557_v53, %v543_v58  ;;  %v694_v53 = vsub.s32 6, %v1650_v19  ;;  %v649_v58 = vrot.slane %v639_v44, %v1654_v21 }
  0xc7   : > { %v653_v59 = vrot.slane %v643_v45, %v1654_v21  ;;  %v721_v19 = vrot.slane %v1573_v1, %v720_v0 }
  0xc8   : > { %v583_v62 = vpop.permute.xlu1 %582  ;;  %v572_v15 = vrot.slane %v560_v5, %v1654_v21  ;;  %v576_v16 = vrot.slane %v561_v6, %v1654_v21  ;;  %v588_v27 = vrot.slane %v560_v5, %v1657_v22  ;;  %v592_v25 = vrot.slane %v561_v6, %v1657_v22 }
  0xc9   : > { %v604_v42 = vrot.slane %v560_v5, %v1669_v34  ;;  %v608_v43 = vrot.slane %v561_v6, %v1669_v34  ;;  %v620_v52 = vrot.slane %v560_v5, %v1677_v39  ;;  %v624_v40 = vrot.slane %v561_v6, %v1677_v39  ;;  %v739_v6 = vpop.permute.xlu0 %738 }
  0xca   : > { %v577_v24 = vmul.f32 %v572_v15, %v567_v63  ;;  %v578_v28 = vmul.f32 %v576_v16, %v567_v63  ;;  %v593_v37 = vmul.f32 %v588_v27, %v583_v62  ;;  %v594_v38 = vmul.f32 %v592_v25, %v583_v62 }
  0xcb   : > { %v679_v62 = vrot.slane %v669_v51, %v1657_v22  ;;  %v691_v63 = vrot.slane %v1573_v1, %v1669_v34  ;;  %v625_v2 = vmul.f32 %v620_v52, %v615_v41  ;;  %v626_v3 = vmul.f32 %v624_v40, %v615_v41 }
  0xcc   : > { %v579_v32 = vadd.f32 %v577_v24, %v535_v30  ;;  %v580_v33 = vadd.f32 %v578_v28, %v536_v31  ;;  %v695_v4 = vrot.slane %v1573_v1, %v694_v53  ;;  %v731_v27 = vrot.slane %v721_v19, %v1677_v39 }
  0xcd   : > { %v599_v12 = vpop.permute.xlu1 %598  ;;  %v701_v20 = vrot.slane %v691_v63, %v1669_v34 }
  0xce   : > { %v595_v46 = vadd.f32 %v593_v37, %v579_v32  ;;  %v596_v47 = vadd.f32 %v594_v38, %v580_v33  ;;  %v609_v48 = vmul.f32 %v604_v42, %v599_v12  ;;  %v610_v49 = vmul.f32 %v608_v43, %v599_v12  ;;  %v1323_v43 = vld [vmem:[%s1834_s2 + $0xc] sm:$0x3] }
  0xcf   : > { %v705_v23 = vrot.slane %v695_v4, %v1669_v34  ;;  %v706_v1 = vmul.f32 %v701_v20, %v686_v54 }
  0xd0   : > { %v611_v57 = vadd.f32 %v609_v48, %v595_v46  ;;  %v612_v55 = vadd.f32 %v610_v49, %v596_v47  ;;  %v782_v46 = vpop.permute.xlu0 %781  ;;  %v844_v48 = vrot.slane %v1323_v43, %v1654_v21  ;;  %v848_v49 = vrot.slane %v1323_v43, %v1657_v22 }
  0xd1   : > { %v707_v32 = vmul.f32 %v705_v23, %v686_v54 }
  0xd2   : > { %v634_v29 = vpop.permute.xlu1 %633  ;;  %v627_v9 = vadd.f32 %v625_v2, %v611_v57  ;;  %v628_v11 = vadd.f32 %v626_v3, %v612_v55 }
  0xd3   : > { %v654_v12 = vmul.f32 %v649_v58, %v634_v29  ;;  %v655_v13 = vmul.f32 %v653_v59, %v634_v29  ;;  %v727_v29 = vrot.slane %v717_v14, %v1677_v39 }
  0xd5   : > { %v656_v24 = vadd.f32 %v654_v12, %v627_v9  ;;  %v657_v28 = vadd.f32 %v655_v13, %v628_v11 }
  0xd7   : > { %v660_v36 = vpop.permute.xlu1 %659 }
  0xd8   : > { %v680_v17 = vmul.f32 %v675_v61, %v660_v36  ;;  %v681_v18 = vmul.f32 %v679_v62, %v660_v36 }
  0xda   : > { %v682_v25 = vadd.f32 %v680_v17, %v656_v24  ;;  %v683_v26 = vadd.f32 %v681_v18, %v657_v28  ;;  %v1325_v28 = vld [vmem:[%s1834_s2 + $0xe] sm:$0x3] }
  0xdc   : > { %v712_v56 = vpop.permute.xlu1 %711  ;;  %v708_v37 = vadd.f32 %v706_v1, %v682_v25  ;;  %v709_v38 = vadd.f32 %v707_v32, %v683_v26  ;;  %v936_v1 = vrot.slane %v1325_v28, %v1654_v21  ;;  %v940_v32 = vrot.slane %v1325_v28, %v1657_v22 }
  0xdd   : > { %v732_v41 = vmul.f32 %v727_v29, %v712_v56  ;;  %v733_v42 = vmul.f32 %v731_v27, %v712_v56  ;;  %v829_v56 = vpop.permute.xlu0 %828 }
  0xdf   : > { %v734_v50 = vadd.f32 %v732_v41, %v708_v37  ;;  %v735_v51 = vadd.f32 %v733_v42, %v709_v38 }
  0xe0   : > { %v737_v5 = vpop.permute.xlu1 %736 }
  0xe1   : > { %v741_v15 = vsel %vm740_vm4, %v737_v5, %v739_v6  ;;  %v745_v16 = vsel %vm740_vm4, %v739_v6, %v737_v5  ;;  %v858_v14 = vpop.permute.xlu0 %857 }
  0xe2   : > { %v759_v30 = vmul.f32 %v752_v7, %v741_v15  ;;  %v760_v31 = vmul.f32 %v756_v8, %v745_v16 }
  0xe4   : > { %v766_v10 = vpop.permute.xlu1 %765  ;;  %v771_v35 = vrot.slane %v759_v30, %v1654_v21  ;;  %v775_v36 = vrot.slane %v760_v31, %v1654_v21  ;;  %v787_v52 = vrot.slane %v759_v30, %v1657_v22  ;;  %v791_v40 = vrot.slane %v760_v31, %v1657_v22 }
  0xe5   : > { %v803_v63 = vrot.slane %v759_v30, %v1669_v34  ;;  %v807_v0 = vrot.slane %v760_v31, %v1669_v34  ;;  %v819_v4 = vrot.slane %v759_v30, %v1677_v39  ;;  %v823_v5 = vrot.slane %v760_v31, %v1677_v39  ;;  %v950_v27 = vpop.permute.xlu0 %949 }
  0xe6   : > { %v776_v44 = vmul.f32 %v771_v35, %v766_v10  ;;  %v777_v45 = vmul.f32 %v775_v36, %v766_v10  ;;  %v792_v59 = vmul.f32 %v787_v52, %v782_v46  ;;  %v793_v60 = vmul.f32 %v791_v40, %v782_v46 }
  0xe8   : > { %v778_v53 = vadd.f32 %v776_v44, %v734_v50  ;;  %v779_v54 = vadd.f32 %v777_v45, %v735_v51 }
  0xe9   : > { %v798_v33 = vpop.permute.xlu1 %797 }
  0xea   : > { %v794_v2 = vadd.f32 %v792_v59, %v778_v53  ;;  %v795_v3 = vadd.f32 %v793_v60, %v779_v54  ;;  %v808_v7 = vmul.f32 %v803_v63, %v798_v33  ;;  %v809_v8 = vmul.f32 %v807_v0, %v798_v33 }
  0xec   : > { %v810_v19 = vadd.f32 %v808_v7, %v794_v2  ;;  %v811_v15 = vadd.f32 %v809_v8, %v795_v3  ;;  %v1327_v2 = vld [vmem:[%s1834_s2 + $0x10] sm:$0x3] }
  0xed   : > { %v1028_v8 = vrot.slane %v1327_v2, %v1654_v21 }
  0xee   : > { %v814_v47 = vpop.permute.xlu1 %813 }
  0xef   : > { %v824_v12 = vmul.f32 %v819_v4, %v814_v47  ;;  %v825_v13 = vmul.f32 %v823_v5, %v814_v47 }
  0xf1   : > { %v826_v20 = vadd.f32 %v824_v12, %v810_v19  ;;  %v827_v23 = vadd.f32 %v825_v13, %v811_v15 }
  0xf2   : > { %v831_v57 = vpop.permute.xlu1 %830 }
  0xf3   : > { %v833_v55 = vsel %vm832_vm5, %v829_v56, %v831_v57  ;;  %v837_v58 = vsel %vm832_vm5, %v831_v57, %v829_v56 }
  0xf4   : > { %v851_v61 = vmul.f32 %v844_v48, %v833_v55  ;;  %v852_v62 = vmul.f32 %v848_v49, %v837_v58  ;;  %v906_v49 = vpop.permute.xlu0 %905 }
  0xf6   : > { %v874_v6 = vpop.permute.xlu1 %873  ;;  %v863_v9 = vrot.slane %v851_v61, %v1654_v21  ;;  %v867_v11 = vrot.slane %v852_v62, %v1654_v21  ;;  %v879_v10 = vrot.slane %v851_v61, %v1657_v22  ;;  %v883_v24 = vrot.slane %v852_v62, %v1657_v22 }
  0xf7   : > { %v895_v33 = vrot.slane %v851_v61, %v1669_v34  ;;  %v899_v35 = vrot.slane %v852_v62, %v1669_v34  ;;  %v911_v47 = vrot.slane %v851_v61, %v1677_v39  ;;  %v915_v48 = vrot.slane %v852_v62, %v1677_v39 }
  0xf8   : > { %v868_v16 = vmul.f32 %v863_v9, %v858_v14  ;;  %v869_v17 = vmul.f32 %v867_v11, %v858_v14  ;;  %v884_v25 = vmul.f32 %v879_v10, %v874_v6  ;;  %v885_v26 = vmul.f32 %v883_v24, %v874_v6 }
  0xf9   : > { %v916_v54 = vmul.f32 %v911_v47, %v906_v49  ;;  %v917_v56 = vmul.f32 %v915_v48, %v906_v49  ;;  %v1032_v9 = vrot.slane %v1327_v2, %v1657_v22 }
  0xfa   : > { %v870_v30 = vadd.f32 %v868_v16, %v826_v20  ;;  %v871_v31 = vadd.f32 %v869_v17, %v827_v23  ;;  %v998_v16 = vpop.permute.xlu0 %997 }
  0xfb   : > { %v890_v18 = vpop.permute.xlu1 %889 }
  0xfc   : > { %v886_v36 = vadd.f32 %v884_v25, %v870_v30  ;;  %v887_v37 = vadd.f32 %v885_v26, %v871_v31  ;;  %v900_v41 = vmul.f32 %v895_v33, %v890_v18  ;;  %v901_v42 = vmul.f32 %v899_v35, %v890_v18 }
  0xfe   : > { %v902_v40 = vadd.f32 %v900_v41, %v886_v36  ;;  %v903_v53 = vadd.f32 %v901_v42, %v887_v37 }
  0xff   : > { %v921_v29 = vpop.permute.xlu1 %920 }
 0x100   : > { %v918_v58 = vadd.f32 %v916_v54, %v902_v40  ;;  %v919_v59 = vadd.f32 %v917_v56, %v903_v53 }
 0x103   : > { %v923_v38 = vpop.permute.xlu1 %922 }
 0x104   : > { %v925_v43 = vsel %vm924_vm6, %v921_v29, %v923_v38  ;;  %v929_v44 = vsel %vm924_vm6, %v923_v38, %v921_v29  ;;  %v1042_v29 = vpop.permute.xlu0 %1041 }
 0x105   : > { %v943_v45 = vmul.f32 %v936_v1, %v925_v43  ;;  %v944_v46 = vmul.f32 %v940_v32, %v929_v44 }
 0x107   : > { %v955_v50 = vrot.slane %v943_v45, %v1654_v21  ;;  %v959_v51 = vrot.slane %v944_v46, %v1654_v21  ;;  %v966_v52 = vpop.permute.xlu1 %965  ;;  %v971_v60 = vrot.slane %v943_v45, %v1657_v22  ;;  %v975_v61 = vrot.slane %v944_v46, %v1657_v22 }
 0x108   : > { %v987_v5 = vrot.slane %v943_v45, %v1669_v34  ;;  %v991_v6 = vrot.slane %v944_v46, %v1669_v34  ;;  %v1003_v19 = vrot.slane %v943_v45, %v1677_v39  ;;  %v1007_v15 = vrot.slane %v944_v46, %v1677_v39  ;;  %v1090_v47 = vpop.permute.xlu0 %1089 }
 0x109   : > { %v960_v57 = vmul.f32 %v955_v50, %v950_v27  ;;  %v961_v55 = vmul.f32 %v959_v51, %v950_v27  ;;  %v976_v3 = vmul.f32 %v971_v60, %v966_v52  ;;  %v977_v4 = vmul.f32 %v975_v61, %v966_v52 }
 0x10a   : > { %v1008_v30 = vmul.f32 %v1003_v19, %v998_v16  ;;  %v1009_v31 = vmul.f32 %v1007_v15, %v998_v16 }
 0x10b   : > { %v962_v62 = vadd.f32 %v960_v57, %v918_v58  ;;  %v963_v0 = vadd.f32 %v961_v55, %v919_v59 }
 0x10c   : > { %v982_v63 = vpop.permute.xlu1 %981 }
 0x10d   : > { %v978_v11 = vadd.f32 %v976_v3, %v962_v62  ;;  %v979_v12 = vadd.f32 %v977_v4, %v963_v0  ;;  %v992_v13 = vmul.f32 %v987_v5, %v982_v63  ;;  %v993_v14 = vmul.f32 %v991_v6, %v982_v63 }
 0x10f   : > { %v994_v23 = vadd.f32 %v992_v13, %v978_v11  ;;  %v995_v10 = vadd.f32 %v993_v14, %v979_v12 }
 0x110   : > { %v1013_v7 = vpop.permute.xlu1 %1012 }
 0x111   : > { %v1010_v33 = vadd.f32 %v1008_v30, %v994_v23  ;;  %v1011_v35 = vadd.f32 %v1009_v31, %v995_v10 }
 0x114   : > { %v1015_v17 = vpop.permute.xlu1 %1014 }
 0x115   : > { %v1017_v18 = vsel %vm1016_vm7, %v1013_v7, %v1015_v17  ;;  %v1021_v20 = vsel %vm1016_vm7, %v1015_v17, %v1013_v7 }
 0x116   : > { %v1035_v24 = vmul.f32 %v1028_v8, %v1017_v18  ;;  %v1036_v28 = vmul.f32 %v1032_v9, %v1021_v20 }
 0x118   : > { %v1047_v27 = vrot.slane %v1035_v24, %v1654_v21  ;;  %v1051_v25 = vrot.slane %v1036_v28, %v1654_v21  ;;  %v1063_v26 = vrot.slane %v1035_v24, %v1657_v22  ;;  %v1067_v1 = vrot.slane %v1036_v28, %v1657_v22  ;;  %v1058_v32 = vpop.permute.xlu1 %1057 }
 0x119   : > { %v1095_v38 = vrot.slane %v1035_v24, %v1677_v39  ;;  %v1099_v41 = vrot.slane %v1036_v28, %v1677_v39  ;;  %v1079_v42 = vrot.slane %v1035_v24, %v1669_v34  ;;  %v1083_v43 = vrot.slane %v1036_v28, %v1669_v34 }
 0x11a   : > { %v1052_v36 = vmul.f32 %v1047_v27, %v1042_v29  ;;  %v1053_v37 = vmul.f32 %v1051_v25, %v1042_v29  ;;  %v1068_v21 = vmul.f32 %v1063_v26, %v1058_v32  ;;  %v1069_v46 = vmul.f32 %v1067_v1, %v1058_v32 }
 0x11b   : > { %v1100_v52 = vmul.f32 %v1095_v38, %v1090_v47  ;;  %v1101_v40 = vmul.f32 %v1099_v41, %v1090_v47 }
 0x11c   : > { %v1054_v44 = vadd.f32 %v1052_v36, %v1010_v33  ;;  %v1055_v45 = vadd.f32 %v1053_v37, %v1011_v35 }
 0x11d   : > { %v1074_v22 = vpop.permute.xlu1 %1073 }
 0x11e   : > { %v1070_v48 = vadd.f32 %v1068_v21, %v1054_v44  ;;  %v1071_v49 = vadd.f32 %v1069_v46, %v1055_v45  ;;  %v1084_v50 = vmul.f32 %v1079_v42, %v1074_v22  ;;  %v1085_v51 = vmul.f32 %v1083_v43, %v1074_v22 }
 0x120   : > { %v1086_v53 = vadd.f32 %v1084_v50, %v1070_v48  ;;  %v1087_v54 = vadd.f32 %v1085_v51, %v1071_v49 }
 0x122   : > { %v1102_v39 = vadd.f32 %v1100_v52, %v1086_v53  ;;  %v1103_v56 = vadd.f32 %v1101_v40, %v1087_v54 }
 0x124   : > { %v1106_v57 = vcombine.low %v1102_v39, %v1103_v56 }
 0x126   : > { %1111 = vst [vmem:[%s1110_s29] sm:$0xff] %v1106_v57 }
 0x127 PF: > { %p1332_p8 = scmp.ne.s32.totalorder %s1464_s19, 1 }
 0x128   : > { %p1333_p9 = scmp.ne.s32.totalorder (!%p1332_p8), %s1460_s18, 0 }
 0x129   : > { %1118 = sbr.rel (%p1332_p8) target bundleno = 775 (0x307), region = 48 }
 0x12e   : > { %1122 = sbr.rel (%p1333_p9) target bundleno = 639 (0x27f), region = 52 }
 0x133   : > { %v1123_v34 = vld [vmem:[#allocation2] sm:$0xff]  ;;  %vm1127_vm8 = vcmask 1043456   ;;  %v1135_v55 = vld [vmem:[#allocation2 + $0x8] sm:$0xff]  ;;  %v1490_v3 = vmov 839922192   ;;  %v1151_v5 = vlaneseq  ;;  %vm1183_vm9 = vcmask 3072  }
 0x134   : > { %v1125_v58 = vcombine.high %v1123_v34, %v1123_v34  ;;  %v1128_v59 = vsel %vm1127_vm8, %v1123_v34, 0.0  ;;  %v1137_v60 = vcombine.high %v1135_v55, %v1135_v55  ;;  %v1139_v63 = vsel %vm1127_vm8, %v1135_v55, 0.0  ;;  %v1179_v32 = vld [vmem:[%s1835_s3] sm:$0xf] }
 0x135   : > { %v1149_v4 = vunpack.c.l.s4 %v1490_v3  ;;  %v1152_v8 = vshrl.u32 %v1151_v5, 7  ;;  %v1185_v36 = vld [vmem:[%s1836_s4] sm:$0xf] }
 0x136   : > { %v1129_v61 = vsel %vm1127_vm8, %v1125_v58, 0.0  ;;  %v1140_v62 = vsel %vm1127_vm8, %v1137_v60, 0.0 }
 0x137   : > { %v1130_v0 = vadd.f32 %v1129_v61, %v1128_v59  ;;  %v1141_v2 = vadd.f32 %v1140_v62, %v1139_v63  ;;  %v1150_v7 = vunpack.c.0.s8 %v1149_v4 }
 0x139   : > { %1131 = vadd.xlane.f32.xlu0 %v1130_v0  ;;  %v1153_v11 = vsub.s32 %v1150_v7, %v1152_v8 }
 0x13d   : > { %1142 = vadd.xlane.f32.xlu0 %v1141_v2 }
 0x1c2   : > { %v1132_v6 = vpop.xlane.xlu0 %1131 }
 0x1c6   : > { %v1143_v9 = vpop.xlane.xlu0 %1142 }
 0x1c7   : > { %v1144_v12 = vadd.f32 %v1143_v9, %v1132_v6 }
 0x1c9   : > { %v1146_v13 = vmul.f32 0.001953125, %v1144_v12 }
 0x1cb   : > { %v1154_v14 = vrot.slane %v1146_v13, %v1153_v11 }
 0x1cd   : > { %v1156_v19 = vsub.f32 %v1123_v34, %v1154_v14  ;;  %v1167_v15 = vsub.f32 %v1135_v55, %v1154_v14 }
 0x1cf   : > { %v1157_v16 = vmul.f32 %v1156_v19, %v1156_v19  ;;  %v1168_v17 = vmul.f32 %v1167_v15, %v1167_v15 }
 0x1d1   : > { %v1159_v18 = vcombine.high %v1157_v16, %v1157_v16  ;;  %v1170_v20 = vcombine.high %v1168_v17, %v1168_v17  ;;  %v1161_v23 = vsel %vm1127_vm8, %v1157_v16, 0.0  ;;  %v1172_v30 = vsel %vm1127_vm8, %v1168_v17, 0.0 }
 0x1d3   : > { %v1162_v10 = vsel %vm1127_vm8, %v1159_v18, 0.0  ;;  %v1173_v28 = vsel %vm1127_vm8, %v1170_v20, 0.0 }
 0x1d4   : > { %v1163_v24 = vadd.f32 %v1162_v10, %v1161_v23  ;;  %v1174_v31 = vadd.f32 %v1173_v28, %v1172_v30 }
 0x1d6   : > { %1164 = vadd.xlane.f32.xlu1 %v1163_v24 }
 0x1da   : > { %1175 = vadd.xlane.f32.xlu1 %v1174_v31 }
 0x25f   : > { %v1165_v29 = vpop.xlane.xlu1 %1164 }
 0x263   : > { %v1176_v27 = vpop.xlane.xlu1 %1175 }
 0x264   : > { %v1177_v25 = vadd.f32 %v1176_v27, %v1165_v29 }
 0x266   : > { %v1178_v26 = vmul.f32 0.001953125, %v1177_v25 }
 0x268   : > { %v1180_v1 = vadd.f32 1e-05, %v1178_v26 }
 0x26a   : > { %1435 = vrsqrt.f32 %v1180_v1 }
 0x277   : > { %v1436_v33 = vpop.eup %1435 }
 0x278   : > { %v1182_v35 = vmul.f32 %v1436_v33, %v1179_v32 }
 0x27a   : > { %1184 = vst.msk [vmem:[#allocation4] sm:$0xf] %vm1183_vm9, %v1182_v35  ;;  %v1186_v37 = vmul.f32 %v1182_v35, %v1146_v13 }
 0x27c   : > { %v1187_v38 = vsub.f32 %v1185_v36, %v1186_v37 }
 0x27e   : > { %1188 = vst.msk [vmem:[#allocation5] sm:$0xf] %vm1183_vm9, %v1187_v38 }
 0x27f PF: > { %v1491_v42 = vmov 0   ;;  %v1492_v44 = vmov 839922192   ;;  %v1204_v21 = vlaneseq  ;;  %s1343_s8 = sshll.u32 %s1460_s18, 3 }
 0x280   : > { %1437 = vset.pattern.permute.xlu0 %v1491_v42  ;;  %v1202_v45 = vunpack.c.l.s4 %v1492_v44  ;;  %s1194_s9 = scalar_lea.vmem [#allocation2], %s1343_s8  ;;  %s1191_s10 = scalar_lea.vmem [#allocation3], %s1343_s8 }
 0x281   : > { %v1196_v41 = vld [vmem:[#allocation4] sm:$0xf]  ;;  %v1205_v47 = vshrl.u32 %v1204_v21, 7 }
 0x282   : > { %1199 = vperm.xlu0 %1437, %v1196_v41   ;;  %v1203_v46 = vunpack.c.0.s8 %v1202_v45  ;;  %v1195_v49 = vld [vmem:[%s1194_s9] sm:$0xff] }
 0x283   : > { %v1192_v51 = vld [vmem:[%s1191_s10] sm:$0xff] }
 0x284   : > { %v1206_v22 = vsub.s32 %v1203_v46, %v1205_v47 }
 0x285   : > { %v1211_v43 = vld [vmem:[#allocation5] sm:$0xf] }
 0x286   : > { %1214 = vperm.xlu0 %1437, %v1211_v43  }
 0x2fd   : > { %v1200_v48 = vpop.permute.xlu0 %1199 }
 0x2fe   : > { %v1207_v50 = vrot.slane %v1200_v48, %v1206_v22 }
 0x300   : > { %v1209_v52 = vmul.f32 %v1207_v50, %v1195_v49 }
 0x301   : > { %v1215_v40 = vpop.permute.xlu0 %1214 }
 0x302   : > { %v1210_v53 = vadd.f32 %v1209_v52, %v1192_v51  ;;  %v1222_v54 = vrot.slane %v1215_v40, %v1206_v22 }
 0x304   : > { %v1224_v39 = vadd.f32 %v1222_v54, %v1210_v53 }
 0x306   : > { %1225 = vst [vmem:[%s1564_s7] sm:$0xff] %v1224_v39 }
 0x307 PF: > { %s15_s22 = sadd.s32 1, %s1476_s22   ;;  %s1838_s18 = smov %s1468_s20 }
 0x308   : > { %p12_p10 = scmp.ge.s32.totalorder %s15_s22, 6   ;;  %s1839_s19 = smov %s1472_s21 }
 0x309   : > { %s1840_s20 = smov %s1843_s23  ;;  %s1841_s21 = smov %s1847_s24 }
 0x30a   :  { %14 = sbr.rel (!%p12_p10) target bundleno = 3 (0x3), region = 102 }

</bundles_post_ra>
